<compile_context>
chip_gen: v7x
topology: tpu7x:2x2x1
jax: 0.10.0
libtpu: 0.0.40
codegen_flags: <defaults>
</compile_context>

<pallas_src>
import functools

import jax
import jax.numpy as jnp
from jax.experimental import pallas as pl
from jax.experimental.pallas import tpu as pltpu

LANE = 128          # vreg lane width
SUBLANE_BF16 = 16   # bf16 packs 2 rows per sublane -> align W tiles to 16


def _round_up(x, m):
    return ((x + m - 1) // m) * m


def _bin_conv2d_kernel(x_ref, w_ref, o_ref, xb_ref, sh_ref, acc_ref, *,
                       th, kh_taps, kw_taps, dil_h, dil_w, pad_h, pad_w,
                       h_in, w_in, w_out_p, cin):
    ht = pl.program_id(1)                      # output H-tile index ("arbitrary")
    halo_h = (kh_taps - 1) * dil_h
    cin_p = xb_ref.shape[-1]
    cout_p = o_ref.shape[-1]

    # ---- once per image: binarize + conv-zero-pad the input into a bf16 scratch
    @pl.when(ht == 0)
    def _build_image_scratch():
        # Zero fill covers: spatial conv padding, H/W tail padding, lane padding.
        xb_ref[...] = jnp.zeros_like(xb_ref)
        xb = jnp.where(x_ref[0] > 0.0, 1.0, -1.0).astype(jnp.bfloat16)  # (h_in,w_in,cin)
        if cin_p > cin:
            # Lane-pad with zeros (padded channels have zero weights, contribute 0).
            xb = jnp.concatenate(
                [xb, jnp.zeros((h_in, w_in, cin_p - cin), jnp.bfloat16)], axis=-1)
        xb_ref[pl.ds(pad_h, h_in), pl.ds(pad_w, w_in), :] = xb

    # ---- once per h-tile: build the kw-shifted, tile-aligned slabs (review item 5)
    row0 = pl.multiple_of(ht * th, th)
    for ikw in range(kw_taps):
        sh_ref[ikw] = xb_ref[pl.ds(row0, th + halo_h),
                             pl.ds(ikw * dil_w, w_out_p), :]

    # ---- KH*KW matmuls (th*w_out_p, cin_p) @ (cin_p, cout_p), f32 VMEM accumulator
    for ikh in range(kh_taps):
        for ikw in range(kw_taps):
            t = ikh * kw_taps + ikw
            xs = sh_ref[ikw, pl.ds(ikh * dil_h, th), :, :]   # (th, w_out_p, cin_p) view
            r = jnp.dot(xs.reshape(th * w_out_p, cin_p), w_ref[t],
                        preferred_element_type=jnp.float32)
            if t == 0:
                acc_ref[...] = r          # init from tap-0 result (no zeros+add)
            else:
                acc_ref[...] += r

    o_ref[0] = acc_ref[...].reshape(th, w_out_p, cout_p)


def bin_conv2d_forward(x_nchw, weight, *, stride=1, padding=0, dilation=(1, 1),
                       groups=1, target_m=1024, max_tile_h=64):
    """Forward of the binarized Conv module. x: NCHW, weight: (O, I/groups, KH, KW)."""
    if isinstance(stride, int):
        stride = (stride, stride)
    if isinstance(padding, int):
        padding = (padding, padding)
    if isinstance(dilation, int):
        dilation = (dilation, dilation)
    if tuple(stride) != (1, 1):
        # TODO(synk): stride > 1 (ERFNet downsamplers) needs strided output windows.
        raise NotImplementedError("bin_conv2d_forward currently supports stride=1 only")

    n, cin, h_in, w_in = x_nchw.shape
    cout, c_per_g, kh_taps, kw_taps = weight.shape
    assert cin == c_per_g * groups and cout % groups == 0
    pad_h, pad_w = padding
    dil_h, dil_w = dilation

    h_out = h_in + 2 * pad_h - dil_h * (kh_taps - 1)
    w_out = w_in + 2 * pad_w - dil_w * (kw_taps - 1)

    cin_p = _round_up(cin, LANE)
    cout_p = _round_up(cout, LANE)
    w_out_p = _round_up(w_out, SUBLANE_BF16)     # tile-aligned output / slab width

    # H-tile size: aim for M = th * w_out_p around target_m; cdiv grid + padded rows
    # (the previous `while h_out % th: th -= 1` could collapse to th=1).
    th = max(1, min(h_out, max_tile_h, max(1, target_m // w_out_p)))
    n_ht = (h_out + th - 1) // th
    h_out_p = th * n_ht

    halo_h = (kh_taps - 1) * dil_h
    h_scr = h_out_p + halo_h                     # >= h_in + 2*pad_h
    w_scr = w_out_p + (kw_taps - 1) * dil_w      # >= w_in + 2*pad_w

    # NCHW -> NHWC with the TRUE channel count (lane padding happens in VMEM only).
    x = jnp.transpose(x_nchw, (0, 2, 3, 1)).astype(jnp.float32)

    # Binarize + group-mask the weights once on the wrapper side into a single bf16
    # tensor: per tap a (cin_p, cout_p) matrix, block-diagonal over groups, zeros
    # elsewhere so padded / cross-group channels contribute exactly 0.
    o_per_g = cout // groups
    wb = jnp.where(weight.astype(jnp.float32) > 0.0, 1.0, -1.0)
    w_taps = jnp.transpose(wb, (2, 3, 1, 0)).reshape(kh_taps * kw_taps, c_per_g, cout)
    w_dense = jnp.zeros((kh_taps * kw_taps, cin_p, cout_p), jnp.float32)
    for g in range(groups):
        ci0, co0 = g * c_per_g, g * o_per_g
        w_dense = w_dense.at[:, ci0:ci0 + c_per_g, co0:co0 + o_per_g].set(
            w_taps[:, :, co0:co0 + o_per_g])
    # TODO(synk): groups>1 wastes groups x MXU FLOPs in this dense block-diagonal
    # layout; large/depthwise group counts should use per-group matmuls instead.
    w_dense = w_dense.astype(jnp.bfloat16)

    kernel = functools.partial(
        _bin_conv2d_kernel, th=th, kh_taps=kh_taps, kw_taps=kw_taps,
        dil_h=dil_h, dil_w=dil_w, pad_h=pad_h, pad_w=pad_w,
        h_in=h_in, w_in=w_in, w_out_p=w_out_p, cin=cin)

    # VMEM budget derived from actual block/scratch sizes (double-buffered blocks).
    bf16, f32 = 2, 4
    est = (2 * (h_in * w_in * max(cin, LANE) * f32)                 # input block
           + 2 * (kh_taps * kw_taps * cin_p * cout_p * bf16)        # weights
           + 2 * (th * w_out_p * cout_p * f32)                      # output block
           + h_scr * w_scr * cin_p * bf16                           # padded image
           + kw_taps * (th + halo_h) * w_out_p * cin_p * bf16       # shifted slabs
           + th * w_out_p * cout_p * f32)                           # accumulator
    # TODO(synk): for v7x-scale feature maps replace the full-image scratch with an
    # H-tiled halo fetch so VMEM stays independent of image size.
    vmem_limit = int(min(max(2 * est, 32 * 1024 * 1024), 112 * 1024 * 1024))

    out = pl.pallas_call(
        kernel,
        out_shape=jax.ShapeDtypeStruct((n, h_out_p, w_out_p, cout_p), jnp.float32),
        grid=(n, n_ht),
        in_specs=[
            # Full image per batch step, true channel count; same block across the
            # h-tile axis -> DMA'd once per image.
            pl.BlockSpec((1, h_in, w_in, cin), lambda b, t: (b, 0, 0, 0)),
            # Binarized bf16 weights, constant block index -> resident for the grid.
            pl.BlockSpec((kh_taps * kw_taps, cin_p, cout_p), lambda b, t: (0, 0, 0)),
        ],
        # Lane-dense (th, w_out_p, 128k) output tiles streamed per grid step.
        out_specs=pl.BlockSpec((1, th, w_out_p, cout_p), lambda b, t: (b, t, 0, 0)),
        scratch_shapes=[
            pltpu.VMEM((h_scr, w_scr, cin_p), jnp.bfloat16),                   # padded image
            pltpu.VMEM((kw_taps, th + halo_h, w_out_p, cin_p), jnp.bfloat16),  # kw-shifted slabs
            pltpu.VMEM((th * w_out_p, cout_p), jnp.float32),                   # accumulator
        ],
        compiler_params=pltpu.CompilerParams(
            # TODO(synk): for batch-1 on v7x make the h-tile axis independent and
            # 'parallel' so both TensorCores are used.
            dimension_semantics=("parallel", "arbitrary"),
            vmem_limit_bytes=vmem_limit,
        ),
    )(x, w_dense)

    # Drop H/W/channel padding, back to NCHW.
    out = out[:, :h_out, :w_out, :cout]
    return jnp.transpose(out, (0, 3, 1, 2)).astype(x_nchw.dtype)


def _ref_forward(x, w, stride, padding, dilation, groups):
    """Pure-JAX reference mirroring the PyTorch Conv.forward (binarize -> conv2d)."""
    xb = jnp.where(x > 0, 1.0, -1.0).astype(jnp.float32)
    wb = jnp.where(w > 0, 1.0, -1.0).astype(jnp.float32)
    return jax.lax.conv_general_dilated(
        xb, wb, window_strides=stride,
        padding=((padding[0], padding[0]), (padding[1], padding[1])),
        rhs_dilation=dilation,
        dimension_numbers=("NCHW", "OIHW", "NCHW"),
        feature_group_count=groups)


if __name__ == "__main__":
    key = jax.random.PRNGKey(0)
    k0, k1, k2, k3 = jax.random.split(key, 4)

    # Config A: plain 3x3 binary conv, padding=1 (ERFNet-style).
    n, cin, h, w, cout = 2, 4, 16, 16, 8
    x_a = jax.random.normal(k0, (n, cin, h, w), jnp.float32)
    w_a = jax.random.normal(k1, (cout, cin, 3, 3), jnp.float32) * 0.2
    out_a = jax.block_until_ready(
        bin_conv2d_forward(x_a, w_a, stride=1, padding=1, dilation=1, groups=1))
    ref_a = _ref_forward(x_a, w_a, (1, 1), (1, 1), (1, 1), 1)
    assert out_a.shape == ref_a.shape
    if not bool(jnp.allclose(out_a, ref_a, atol=1e-4, rtol=1e-4)):
        raise AssertionError("Pallas binary conv mismatch vs JAX reference (config A)")

    # Config B: dilated (d=2, pad=2), grouped (groups=2) 3x3 binary conv.
    cin_b = cout_b = 8
    groups_b = 2
    x_b = jax.random.normal(k2, (n, cin_b, h, w), jnp.float32)
    w_b = jax.random.normal(k3, (cout_b, cin_b // groups_b, 3, 3), jnp.float32) * 0.2
    out_b = jax.block_until_ready(
        bin_conv2d_forward(x_b, w_b, stride=1, padding=2, dilation=2, groups=groups_b))
    ref_b = _ref_forward(x_b, w_b, (1, 1), (2, 2), (2, 2), groups_b)
    assert out_b.shape == ref_b.shape
    if not bool(jnp.allclose(out_b, ref_b, atol=1e-4, rtol=1e-4)):
        raise AssertionError("Pallas binary conv mismatch vs JAX reference (config B)")

    print("KERNEL_OK")
</pallas_src>

<mosaic_0001>
module attributes {stable_mosaic.version = 11 : i64} {
  func.func @_bin_conv2d_kernel(%arg0: i32, %arg1: i32, %arg2: memref<1x16x16x4xf32, #tpu.memory_space<vmem>>, %arg3: memref<9x128x128xbf16, #tpu.memory_space<vmem>>, %arg4: memref<1x16x16x128xf32, #tpu.memory_space<vmem>>, %arg5: memref<18x18x128xbf16, #tpu.memory_space<vmem>>, %arg6: memref<3x18x16x128xbf16, #tpu.memory_space<vmem>>, %arg7: memref<256x128xf32, #tpu.memory_space<vmem>>) attributes {dimension_semantics = [#tpu.dimension_semantics<parallel>, #tpu.dimension_semantics<arbitrary>], iteration_bounds = array<i64: 2, 1>, scalar_prefetch = 0 : i64, scratch_operands = 3 : i64, tpu.core_type = #tpu.core_type<tc>, window_params = [{transform_indices = @transform_0, window_bounds = array<i64: 1, 16, 16, 4>}, {pipeline_mode = #tpu.pipeline_mode<synchronous>, transform_indices = @transform_1, window_bounds = array<i64: 9, 128, 128>}, {transform_indices = @transform_2, window_bounds = array<i64: 1, 16, 16, 128>}]} {
    %c0_i32 = arith.constant 0 : i32
    %0 = arith.cmpi eq, %arg1, %c0_i32 : i32
    %1 = arith.extui %0 : i1 to i32
    %c0_i32_0 = arith.constant 0 : i32
    %2 = arith.cmpi ne, %1, %c0_i32_0 : i32
    scf.if %2 {
      %cst_121 = arith.constant 0.000000e+00 : bf16
      %104 = vector.broadcast %cst_121 : bf16 to vector<18x18x128xbf16>
      %c0_122 = arith.constant 0 : index
      %c0_123 = arith.constant 0 : index
      %c0_124 = arith.constant 0 : index
      %105 = vector.load %arg5[%c0_122, %c0_123, %c0_124] : memref<18x18x128xbf16, #tpu.memory_space<vmem>>, vector<18x18x128xbf16>
      tpu.vector_store %arg5[%c0_122, %c0_123, %c0_124], %104 {strides = array<i32>} : memref<18x18x128xbf16, #tpu.memory_space<vmem>>, vector<18x18x128xbf16>,
      %c0_125 = arith.constant 0 : index
      %c0_126 = arith.constant 0 : index
      %c0_127 = arith.constant 0 : index
      %c0_128 = arith.constant 0 : index
      %106 = vector.load %arg2[%c0_125, %c0_126, %c0_127, %c0_128] : memref<1x16x16x4xf32, #tpu.memory_space<vmem>>, vector<1x16x16x4xf32>
      %107 = vector.shape_cast %106 : vector<1x16x16x4xf32> to vector<16x16x4xf32>
      %cst_129 = arith.constant 0.000000e+00 : f32
      %108 = vector.broadcast %cst_129 : f32 to vector<16x16x4xf32>
      %109 = arith.cmpf ogt, %107, %108 : vector<16x16x4xf32>
      %cst_130 = arith.constant 1.000000e+00 : f32
      %cst_131 = arith.constant -1.000000e+00 : f32
      %110 = vector.broadcast %cst_130 : f32 to vector<16x16x4xf32>
      %111 = vector.broadcast %cst_131 : f32 to vector<16x16x4xf32>
      %112 = arith.select %109, %110, %111 : vector<16x16x4xi1>, vector<16x16x4xf32>
      %113 = arith.truncf %112 : vector<16x16x4xf32> to vector<16x16x4xbf16>
      %cst_132 = arith.constant 0.000000e+00 : bf16
      %114 = vector.broadcast %cst_132 : bf16 to vector<16x16x124xbf16>
      %115 = tpu.concatenate %113, %114 in 2 : vector<16x16x4xbf16>, vector<16x16x124xbf16> -> vector<16x16x128xbf16>
      %c1_133 = arith.constant 1 : index
      %c1_134 = arith.constant 1 : index
      %c0_135 = arith.constant 0 : index
      %116 = vector.load %arg5[%c1_133, %c1_134, %c0_135] : memref<18x18x128xbf16, #tpu.memory_space<vmem>>, vector<16x16x128xbf16>
      tpu.vector_store %arg5[%c1_133, %c1_134, %c0_135], %115 {strides = array<i32>} : memref<18x18x128xbf16, #tpu.memory_space<vmem>>, vector<16x16x128xbf16>,
    } else {
    }
    %c16_i32 = arith.constant 16 : i32
    %3 = arith.muli %arg1, %c16_i32 : i32
    %4 = tpu.assume_multiple %3, 16 : i32
    %5 = arith.index_cast %4 : i32 to index
    %c0 = arith.constant 0 : index
    %c0_1 = arith.constant 0 : index
    %6 = vector.load %arg5[%5, %c0, %c0_1] : memref<18x18x128xbf16, #tpu.memory_space<vmem>>, vector<18x16x128xbf16>
    %c0_2 = arith.constant 0 : index
    %c0_3 = arith.constant 0 : index
    %c0_4 = arith.constant 0 : index
    %c0_5 = arith.constant 0 : index
    %7 = vector.load %arg6[%c0_2, %c0_3, %c0_4, %c0_5] : memref<3x18x16x128xbf16, #tpu.memory_space<vmem>>, vector<1x18x16x128xbf16>
    %8 = vector.shape_cast %7 : vector<1x18x16x128xbf16> to vector<18x16x128xbf16>
    %9 = vector.shape_cast %6 : vector<18x16x128xbf16> to vector<1x18x16x128xbf16>
    tpu.vector_store %arg6[%c0_2, %c0_3, %c0_4, %c0_5], %9 {strides = array<i32>} : memref<3x18x16x128xbf16, #tpu.memory_space<vmem>>, vector<1x18x16x128xbf16>,
    %10 = arith.index_cast %4 : i32 to index
    %c1 = arith.constant 1 : index
    %c0_6 = arith.constant 0 : index
    %11 = vector.load %arg5[%10, %c1, %c0_6] : memref<18x18x128xbf16, #tpu.memory_space<vmem>>, vector<18x16x128xbf16>
    %c1_7 = arith.constant 1 : index
    %c0_8 = arith.constant 0 : index
    %c0_9 = arith.constant 0 : index
    %c0_10 = arith.constant 0 : index
    %12 = vector.load %arg6[%c1_7, %c0_8, %c0_9, %c0_10] : memref<3x18x16x128xbf16, #tpu.memory_space<vmem>>, vector<1x18x16x128xbf16>
    %13 = vector.shape_cast %12 : vector<1x18x16x128xbf16> to vector<18x16x128xbf16>
    %14 = vector.shape_cast %11 : vector<18x16x128xbf16> to vector<1x18x16x128xbf16>
    tpu.vector_store %arg6[%c1_7, %c0_8, %c0_9, %c0_10], %14 {strides = array<i32>} : memref<3x18x16x128xbf16, #tpu.memory_space<vmem>>, vector<1x18x16x128xbf16>,
    %15 = arith.index_cast %4 : i32 to index
    %c2 = arith.constant 2 : index
    %c0_11 = arith.constant 0 : index
    %16 = vector.load %arg5[%15, %c2, %c0_11] : memref<18x18x128xbf16, #tpu.memory_space<vmem>>, vector<18x16x128xbf16>
    %c2_12 = arith.constant 2 : index
    %c0_13 = arith.constant 0 : index
    %c0_14 = arith.constant 0 : index
    %c0_15 = arith.constant 0 : index
    %17 = vector.load %arg6[%c2_12, %c0_13, %c0_14, %c0_15] : memref<3x18x16x128xbf16, #tpu.memory_space<vmem>>, vector<1x18x16x128xbf16>
    %18 = vector.shape_cast %17 : vector<1x18x16x128xbf16> to vector<18x16x128xbf16>
    %19 = vector.shape_cast %16 : vector<18x16x128xbf16> to vector<1x18x16x128xbf16>
    tpu.vector_store %arg6[%c2_12, %c0_13, %c0_14, %c0_15], %19 {strides = array<i32>} : memref<3x18x16x128xbf16, #tpu.memory_space<vmem>>, vector<1x18x16x128xbf16>,
    %c0_16 = arith.constant 0 : index
    %c0_17 = arith.constant 0 : index
    %c0_18 = arith.constant 0 : index
    %c0_19 = arith.constant 0 : index
    %20 = vector.load %arg6[%c0_16, %c0_17, %c0_18, %c0_19] : memref<3x18x16x128xbf16, #tpu.memory_space<vmem>>, vector<1x16x16x128xbf16>
    %21 = vector.shape_cast %20 : vector<1x16x16x128xbf16> to vector<16x16x128xbf16>
    %22 = vector.shape_cast %21 : vector<16x16x128xbf16> to vector<256x128xbf16>
    %c0_20 = arith.constant 0 : index
    %c0_21 = arith.constant 0 : index
    %c0_22 = arith.constant 0 : index
    %23 = vector.load %arg3[%c0_20, %c0_21, %c0_22] : memref<9x128x128xbf16, #tpu.memory_space<vmem>>, vector<1x128x128xbf16>
    %24 = vector.shape_cast %23 : vector<1x128x128xbf16> to vector<128x128xbf16>
    %cst = arith.constant dense<0.000000e+00> : vector<256x128xf32>
    %25 = tpu.matmul %22, %24, %cst {dimension_numbers = #tpu.dot_dimension_numbers<[1], [0], [0], [1], [0, 0, 1, 1], [], []>} : vector<256x128xbf16>, vector<128x128xbf16>, vector<256x128xf32> -> vector<256x128xf32>
    %c0_23 = arith.constant 0 : index
    %c0_24 = arith.constant 0 : index
    %26 = vector.load %arg7[%c0_23, %c0_24] : memref<256x128xf32, #tpu.memory_space<vmem>>, vector<256x128xf32>
    tpu.vector_store %arg7[%c0_23, %c0_24], %25 {strides = array<i32>} : memref<256x128xf32, #tpu.memory_space<vmem>>, vector<256x128xf32>,
    %c1_25 = arith.constant 1 : index
    %c0_26 = arith.constant 0 : index
    %c0_27 = arith.constant 0 : index
    %c0_28 = arith.constant 0 : index
    %27 = vector.load %arg6[%c1_25, %c0_26, %c0_27, %c0_28] : memref<3x18x16x128xbf16, #tpu.memory_space<vmem>>, vector<1x16x16x128xbf16>
    %28 = vector.shape_cast %27 : vector<1x16x16x128xbf16> to vector<16x16x128xbf16>
    %29 = vector.shape_cast %28 : vector<16x16x128xbf16> to vector<256x128xbf16>
    %c1_29 = arith.constant 1 : index
    %c0_30 = arith.constant 0 : index
    %c0_31 = arith.constant 0 : index
    %30 = vector.load %arg3[%c1_29, %c0_30, %c0_31] : memref<9x128x128xbf16, #tpu.memory_space<vmem>>, vector<1x128x128xbf16>
    %31 = vector.shape_cast %30 : vector<1x128x128xbf16> to vector<128x128xbf16>
    %cst_32 = arith.constant dense<0.000000e+00> : vector<256x128xf32>
    %32 = tpu.matmul %29, %31, %cst_32 {dimension_numbers = #tpu.dot_dimension_numbers<[1], [0], [0], [1], [0, 0, 1, 1], [], []>} : vector<256x128xbf16>, vector<128x128xbf16>, vector<256x128xf32> -> vector<256x128xf32>
    %c0_33 = arith.constant 0 : index
    %c0_34 = arith.constant 0 : index
    %33 = vector.load %arg7[%c0_33, %c0_34] : memref<256x128xf32, #tpu.memory_space<vmem>>, vector<256x128xf32>
    %34 = arith.addf %33, %32 : vector<256x128xf32>
    %c0_35 = arith.constant 0 : index
    %c0_36 = arith.constant 0 : index
    %35 = vector.load %arg7[%c0_35, %c0_36] : memref<256x128xf32, #tpu.memory_space<vmem>>, vector<256x128xf32>
    tpu.vector_store %arg7[%c0_35, %c0_36], %34 {strides = array<i32>} : memref<256x128xf32, #tpu.memory_space<vmem>>, vector<256x128xf32>,
    %c2_37 = arith.constant 2 : index
    %c0_38 = arith.constant 0 : index
    %c0_39 = arith.constant 0 : index
    %c0_40 = arith.constant 0 : index
    %36 = vector.load %arg6[%c2_37, %c0_38, %c0_39, %c0_40] : memref<3x18x16x128xbf16, #tpu.memory_space<vmem>>, vector<1x16x16x128xbf16>
    %37 = vector.shape_cast %36 : vector<1x16x16x128xbf16> to vector<16x16x128xbf16>
    %38 = vector.shape_cast %37 : vector<16x16x128xbf16> to vector<256x128xbf16>
    %c2_41 = arith.constant 2 : index
    %c0_42 = arith.constant 0 : index
    %c0_43 = arith.constant 0 : index
    %39 = vector.load %arg3[%c2_41, %c0_42, %c0_43] : memref<9x128x128xbf16, #tpu.memory_space<vmem>>, vector<1x128x128xbf16>
    %40 = vector.shape_cast %39 : vector<1x128x128xbf16> to vector<128x128xbf16>
    %cst_44 = arith.constant dense<0.000000e+00> : vector<256x128xf32>
    %41 = tpu.matmul %38, %40, %cst_44 {dimension_numbers = #tpu.dot_dimension_numbers<[1], [0], [0], [1], [0, 0, 1, 1], [], []>} : vector<256x128xbf16>, vector<128x128xbf16>, vector<256x128xf32> -> vector<256x128xf32>
    %c0_45 = arith.constant 0 : index
    %c0_46 = arith.constant 0 : index
    %42 = vector.load %arg7[%c0_45, %c0_46] : memref<256x128xf32, #tpu.memory_space<vmem>>, vector<256x128xf32>
    %43 = arith.addf %42, %41 : vector<256x128xf32>
    %c0_47 = arith.constant 0 : index
    %c0_48 = arith.constant 0 : index
    %44 = vector.load %arg7[%c0_47, %c0_48] : memref<256x128xf32, #tpu.memory_space<vmem>>, vector<256x128xf32>
    tpu.vector_store %arg7[%c0_47, %c0_48], %43 {strides = array<i32>} : memref<256x128xf32, #tpu.memory_space<vmem>>, vector<256x128xf32>,
    %c0_49 = arith.constant 0 : index
    %c1_50 = arith.constant 1 : index
    %c0_51 = arith.constant 0 : index
    %c0_52 = arith.constant 0 : index
    %45 = vector.load %arg6[%c0_49, %c1_50, %c0_51, %c0_52] : memref<3x18x16x128xbf16, #tpu.memory_space<vmem>>, vector<1x16x16x128xbf16>
    %46 = vector.shape_cast %45 : vector<1x16x16x128xbf16> to vector<16x16x128xbf16>
    %47 = vector.shape_cast %46 : vector<16x16x128xbf16> to vector<256x128xbf16>
    %c3 = arith.constant 3 : index
    %c0_53 = arith.constant 0 : index
    %c0_54 = arith.constant 0 : index
    %48 = vector.load %arg3[%c3, %c0_53, %c0_54] : memref<9x128x128xbf16, #tpu.memory_space<vmem>>, vector<1x128x128xbf16>
    %49 = vector.shape_cast %48 : vector<1x128x128xbf16> to vector<128x128xbf16>
    %cst_55 = arith.constant dense<0.000000e+00> : vector<256x128xf32>
    %50 = tpu.matmul %47, %49, %cst_55 {dimension_numbers = #tpu.dot_dimension_numbers<[1], [0], [0], [1], [0, 0, 1, 1], [], []>} : vector<256x128xbf16>, vector<128x128xbf16>, vector<256x128xf32> -> vector<256x128xf32>
    %c0_56 = arith.constant 0 : index
    %c0_57 = arith.constant 0 : index
    %51 = vector.load %arg7[%c0_56, %c0_57] : memref<256x128xf32, #tpu.memory_space<vmem>>, vector<256x128xf32>
    %52 = arith.addf %51, %50 : vector<256x128xf32>
    %c0_58 = arith.constant 0 : index
    %c0_59 = arith.constant 0 : index
    %53 = vector.load %arg7[%c0_58, %c0_59] : memref<256x128xf32, #tpu.memory_space<vmem>>, vector<256x128xf32>
    tpu.vector_store %arg7[%c0_58, %c0_59], %52 {strides = array<i32>} : memref<256x128xf32, #tpu.memory_space<vmem>>, vector<256x128xf32>,
    %c1_60 = arith.constant 1 : index
    %c1_61 = arith.constant 1 : index
    %c0_62 = arith.constant 0 : index
    %c0_63 = arith.constant 0 : index
    %54 = vector.load %arg6[%c1_60, %c1_61, %c0_62, %c0_63] : memref<3x18x16x128xbf16, #tpu.memory_space<vmem>>, vector<1x16x16x128xbf16>
    %55 = vector.shape_cast %54 : vector<1x16x16x128xbf16> to vector<16x16x128xbf16>
    %56 = vector.shape_cast %55 : vector<16x16x128xbf16> to vector<256x128xbf16>
    %c4 = arith.constant 4 : index
    %c0_64 = arith.constant 0 : index
    %c0_65 = arith.constant 0 : index
    %57 = vector.load %arg3[%c4, %c0_64, %c0_65] : memref<9x128x128xbf16, #tpu.memory_space<vmem>>, vector<1x128x128xbf16>
    %58 = vector.shape_cast %57 : vector<1x128x128xbf16> to vector<128x128xbf16>
    %cst_66 = arith.constant dense<0.000000e+00> : vector<256x128xf32>
    %59 = tpu.matmul %56, %58, %cst_66 {dimension_numbers = #tpu.dot_dimension_numbers<[1], [0], [0], [1], [0, 0, 1, 1], [], []>} : vector<256x128xbf16>, vector<128x128xbf16>, vector<256x128xf32> -> vector<256x128xf32>
    %c0_67 = arith.constant 0 : index
    %c0_68 = arith.constant 0 : index
    %60 = vector.load %arg7[%c0_67, %c0_68] : memref<256x128xf32, #tpu.memory_space<vmem>>, vector<256x128xf32>
    %61 = arith.addf %60, %59 : vector<256x128xf32>
    %c0_69 = arith.constant 0 : index
    %c0_70 = arith.constant 0 : index
    %62 = vector.load %arg7[%c0_69, %c0_70] : memref<256x128xf32, #tpu.memory_space<vmem>>, vector<256x128xf32>
    tpu.vector_store %arg7[%c0_69, %c0_70], %61 {strides = array<i32>} : memref<256x128xf32, #tpu.memory_space<vmem>>, vector<256x128xf32>,
    %c2_71 = arith.constant 2 : index
    %c1_72 = arith.constant 1 : index
    %c0_73 = arith.constant 0 : index
    %c0_74 = arith.constant 0 : index
    %63 = vector.load %arg6[%c2_71, %c1_72, %c0_73, %c0_74] : memref<3x18x16x128xbf16, #tpu.memory_space<vmem>>, vector<1x16x16x128xbf16>
    %64 = vector.shape_cast %63 : vector<1x16x16x128xbf16> to vector<16x16x128xbf16>
    %65 = vector.shape_cast %64 : vector<16x16x128xbf16> to vector<256x128xbf16>
    %c5 = arith.constant 5 : index
    %c0_75 = arith.constant 0 : index
    %c0_76 = arith.constant 0 : index
    %66 = vector.load %arg3[%c5, %c0_75, %c0_76] : memref<9x128x128xbf16, #tpu.memory_space<vmem>>, vector<1x128x128xbf16>
    %67 = vector.shape_cast %66 : vector<1x128x128xbf16> to vector<128x128xbf16>
    %cst_77 = arith.constant dense<0.000000e+00> : vector<256x128xf32>
    %68 = tpu.matmul %65, %67, %cst_77 {dimension_numbers = #tpu.dot_dimension_numbers<[1], [0], [0], [1], [0, 0, 1, 1], [], []>} : vector<256x128xbf16>, vector<128x128xbf16>, vector<256x128xf32> -> vector<256x128xf32>
    %c0_78 = arith.constant 0 : index
    %c0_79 = arith.constant 0 : index
    %69 = vector.load %arg7[%c0_78, %c0_79] : memref<256x128xf32, #tpu.memory_space<vmem>>, vector<256x128xf32>
    %70 = arith.addf %69, %68 : vector<256x128xf32>
    %c0_80 = arith.constant 0 : index
    %c0_81 = arith.constant 0 : index
    %71 = vector.load %arg7[%c0_80, %c0_81] : memref<256x128xf32, #tpu.memory_space<vmem>>, vector<256x128xf32>
    tpu.vector_store %arg7[%c0_80, %c0_81], %70 {strides = array<i32>} : memref<256x128xf32, #tpu.memory_space<vmem>>, vector<256x128xf32>,
    %c0_82 = arith.constant 0 : index
    %c2_83 = arith.constant 2 : index
    %c0_84 = arith.constant 0 : index
    %c0_85 = arith.constant 0 : index
    %72 = vector.load %arg6[%c0_82, %c2_83, %c0_84, %c0_85] : memref<3x18x16x128xbf16, #tpu.memory_space<vmem>>, vector<1x16x16x128xbf16>
    %73 = vector.shape_cast %72 : vector<1x16x16x128xbf16> to vector<16x16x128xbf16>
    %74 = vector.shape_cast %73 : vector<16x16x128xbf16> to vector<256x128xbf16>
    %c6 = arith.constant 6 : index
    %c0_86 = arith.constant 0 : index
    %c0_87 = arith.constant 0 : index
    %75 = vector.load %arg3[%c6, %c0_86, %c0_87] : memref<9x128x128xbf16, #tpu.memory_space<vmem>>, vector<1x128x128xbf16>
    %76 = vector.shape_cast %75 : vector<1x128x128xbf16> to vector<128x128xbf16>
    %cst_88 = arith.constant dense<0.000000e+00> : vector<256x128xf32>
    %77 = tpu.matmul %74, %76, %cst_88 {dimension_numbers = #tpu.dot_dimension_numbers<[1], [0], [0], [1], [0, 0, 1, 1], [], []>} : vector<256x128xbf16>, vector<128x128xbf16>, vector<256x128xf32> -> vector<256x128xf32>
    %c0_89 = arith.constant 0 : index
    %c0_90 = arith.constant 0 : index
    %78 = vector.load %arg7[%c0_89, %c0_90] : memref<256x128xf32, #tpu.memory_space<vmem>>, vector<256x128xf32>
    %79 = arith.addf %78, %77 : vector<256x128xf32>
    %c0_91 = arith.constant 0 : index
    %c0_92 = arith.constant 0 : index
    %80 = vector.load %arg7[%c0_91, %c0_92] : memref<256x128xf32, #tpu.memory_space<vmem>>, vector<256x128xf32>
    tpu.vector_store %arg7[%c0_91, %c0_92], %79 {strides = array<i32>} : memref<256x128xf32, #tpu.memory_space<vmem>>, vector<256x128xf32>,
    %c1_93 = arith.constant 1 : index
    %c2_94 = arith.constant 2 : index
    %c0_95 = arith.constant 0 : index
    %c0_96 = arith.constant 0 : index
    %81 = vector.load %arg6[%c1_93, %c2_94, %c0_95, %c0_96] : memref<3x18x16x128xbf16, #tpu.memory_space<vmem>>, vector<1x16x16x128xbf16>
    %82 = vector.shape_cast %81 : vector<1x16x16x128xbf16> to vector<16x16x128xbf16>
    %83 = vector.shape_cast %82 : vector<16x16x128xbf16> to vector<256x128xbf16>
    %c7 = arith.constant 7 : index
    %c0_97 = arith.constant 0 : index
    %c0_98 = arith.constant 0 : index
    %84 = vector.load %arg3[%c7, %c0_97, %c0_98] : memref<9x128x128xbf16, #tpu.memory_space<vmem>>, vector<1x128x128xbf16>
    %85 = vector.shape_cast %84 : vector<1x128x128xbf16> to vector<128x128xbf16>
    %cst_99 = arith.constant dense<0.000000e+00> : vector<256x128xf32>
    %86 = tpu.matmul %83, %85, %cst_99 {dimension_numbers = #tpu.dot_dimension_numbers<[1], [0], [0], [1], [0, 0, 1, 1], [], []>} : vector<256x128xbf16>, vector<128x128xbf16>, vector<256x128xf32> -> vector<256x128xf32>
    %c0_100 = arith.constant 0 : index
    %c0_101 = arith.constant 0 : index
    %87 = vector.load %arg7[%c0_100, %c0_101] : memref<256x128xf32, #tpu.memory_space<vmem>>, vector<256x128xf32>
    %88 = arith.addf %87, %86 : vector<256x128xf32>
    %c0_102 = arith.constant 0 : index
    %c0_103 = arith.constant 0 : index
    %89 = vector.load %arg7[%c0_102, %c0_103] : memref<256x128xf32, #tpu.memory_space<vmem>>, vector<256x128xf32>
    tpu.vector_store %arg7[%c0_102, %c0_103], %88 {strides = array<i32>} : memref<256x128xf32, #tpu.memory_space<vmem>>, vector<256x128xf32>,
    %c2_104 = arith.constant 2 : index
    %c2_105 = arith.constant 2 : index
    %c0_106 = arith.constant 0 : index
    %c0_107 = arith.constant 0 : index
    %90 = vector.load %arg6[%c2_104, %c2_105, %c0_106, %c0_107] : memref<3x18x16x128xbf16, #tpu.memory_space<vmem>>, vector<1x16x16x128xbf16>
    %91 = vector.shape_cast %90 : vector<1x16x16x128xbf16> to vector<16x16x128xbf16>
    %92 = vector.shape_cast %91 : vector<16x16x128xbf16> to vector<256x128xbf16>
    %c8 = arith.constant 8 : index
    %c0_108 = arith.constant 0 : index
    %c0_109 = arith.constant 0 : index
    %93 = vector.load %arg3[%c8, %c0_108, %c0_109] : memref<9x128x128xbf16, #tpu.memory_space<vmem>>, vector<1x128x128xbf16>
    %94 = vector.shape_cast %93 : vector<1x128x128xbf16> to vector<128x128xbf16>
    %cst_110 = arith.constant dense<0.000000e+00> : vector<256x128xf32>
    %95 = tpu.matmul %92, %94, %cst_110 {dimension_numbers = #tpu.dot_dimension_numbers<[1], [0], [0], [1], [0, 0, 1, 1], [], []>} : vector<256x128xbf16>, vector<128x128xbf16>, vector<256x128xf32> -> vector<256x128xf32>
    %c0_111 = arith.constant 0 : index
    %c0_112 = arith.constant 0 : index
    %96 = vector.load %arg7[%c0_111, %c0_112] : memref<256x128xf32, #tpu.memory_space<vmem>>, vector<256x128xf32>
    %97 = arith.addf %96, %95 : vector<256x128xf32>
    %c0_113 = arith.constant 0 : index
    %c0_114 = arith.constant 0 : index
    %98 = vector.load %arg7[%c0_113, %c0_114] : memref<256x128xf32, #tpu.memory_space<vmem>>, vector<256x128xf32>
    tpu.vector_store %arg7[%c0_113, %c0_114], %97 {strides = array<i32>} : memref<256x128xf32, #tpu.memory_space<vmem>>, vector<256x128xf32>,
    %c0_115 = arith.constant 0 : index
    %c0_116 = arith.constant 0 : index
    %99 = vector.load %arg7[%c0_115, %c0_116] : memref<256x128xf32, #tpu.memory_space<vmem>>, vector<256x128xf32>
    %100 = vector.shape_cast %99 : vector<256x128xf32> to vector<16x16x128xf32>
    %c0_117 = arith.constant 0 : index
    %c0_118 = arith.constant 0 : index
    %c0_119 = arith.constant 0 : index
    %c0_120 = arith.constant 0 : index
    %101 = vector.load %arg4[%c0_117, %c0_118, %c0_119, %c0_120] : memref<1x16x16x128xf32, #tpu.memory_space<vmem>>, vector<1x16x16x128xf32>
    %102 = vector.shape_cast %101 : vector<1x16x16x128xf32> to vector<16x16x128xf32>
    %103 = vector.shape_cast %100 : vector<16x16x128xf32> to vector<1x16x16x128xf32>
    tpu.vector_store %arg4[%c0_117, %c0_118, %c0_119, %c0_120], %103 {strides = array<i32>} : memref<1x16x16x128xf32, #tpu.memory_space<vmem>>, vector<1x16x16x128xf32>,
    return
  }
  func.func @transform_0(%arg0: i32, %arg1: i32) -> (i32, i32, i32, i32) {
    %c0_i32 = arith.constant 0 : i32
    %c0_i32_0 = arith.constant 0 : i32
    %c0_i32_1 = arith.constant 0 : i32
    %c0_i32_2 = arith.constant 0 : i32
    return %arg0, %c0_i32, %c0_i32_0, %c0_i32_1 : i32, i32, i32, i32
  }
  func.func @transform_1(%arg0: i32, %arg1: i32) -> (i32, i32, i32) {
    %c0_i32 = arith.constant 0 : i32
    %c0_i32_0 = arith.constant 0 : i32
    %c0_i32_1 = arith.constant 0 : i32
    %c0_i32_2 = arith.constant 0 : i32
    return %c0_i32, %c0_i32_0, %c0_i32_1 : i32, i32, i32
  }
  func.func @transform_2(%arg0: i32, %arg1: i32) -> (i32, i32, i32, i32) {
    %c0_i32 = arith.constant 0 : i32
    %c0_i32_0 = arith.constant 0 : i32
    %c0_i32_1 = arith.constant 0 : i32
    return %arg0, %arg1, %c0_i32, %c0_i32_0 : i32, i32, i32, i32
  }
}

</mosaic_0001>

<bundles_post_ra>
// kernel: tpu_custom_call.1
= control target key start
LH: loop header
LB: loop body
LE: loop exit
PB: predicated region body
PF: predicated region fallthrough
CT: control target
= control target key end

     0   :  { %7 = vsyncpa [#allocation6], 0  ;;  %s7490_s0 = inlined_call_operand.vmem [shape: f32[2,16,16,4], index: 0, kind: input, shape index: {}]   ;;  %s7491_s1 = inlined_call_operand.vmem [shape: bf16[9,128,128], index: 1, kind: input, shape index: {}]   ;;  %s7492_s2 = inlined_call_operand.hbm [shape: f32[2,16,16,128], index: 2, kind: output, shape index: {}]  }
   0x1   :  { %9 = vsyncpa [#allocation6 + $0x1], 0  ;;  %s6530_s9 = smov 0   ;;  %s6532_s10 = smov 0  }
   0x2   :  { %s6534_s11 = smov 0   ;;  %s6536_s12 = smov 0  }
   0x3   :  { %s6538_s13 = smov 0   ;;  %s6540_s14 = smov 0  }
   0x4 LB: > { %s4930_s15 = sadd.s32 4294967295, %s6508_s14   ;;  %s4931_s16 = sadd.s32 4294967294, %s6508_s14   ;;  %s6508_s14 = sphi %s6540_s14, %s15_s14   ;;  %s6504_s13 = sphi %s6538_s13, %s7505_s13   ;;  %s6500_s12 = sphi %s6536_s12, %s7504_s12   ;;  %s6496_s11 = sphi %s6534_s11, %s7503_s11   ;;  %s6492_s10 = sphi %s6532_s10, %s7502_s10   ;;  %s6488_s9 = sphi %s6530_s9, %s7501_s9  }
   0x5   : > { %s27_s17 = sadd.s32 1, %s6504_s13  ;;  %s83_s18 = sadd.s32 1, %s6496_s11 }
   0x6   : > { %p29_p0 = scmp.ge.s32.totalorder %s27_s17, 2  ;;  %p93_p1 = scmp.ne.s32.totalorder %s6496_s11, %s6492_s10 }
   0x7   : > { %p94_p2 = scmp.eq.s32.totalorder %s4930_s15, 1  ;;  %p99_p3 = scmp.ne.s32.totalorder %s6492_s10, %s6488_s9 }
   0x8   : > { %s7507_s17 = smov (%p29_p0, %s27_s17), 0  ;;  %p100_p5 = scmp.eq.s32.totalorder %s4931_s16, 1 }
   0x9   : > { %p6570_p4 = por %p94_p2, %p93_p1  ;;  %s78_s20 = ssub.s32 %s6504_s13, %s7507_s17 }
   0xa   : > { %p4934_p6 = scmp.ge.s32.totalorder %s6508_s14, 1  ;;  %p81_p7 = scmp.eq.s32.totalorder %s78_s20, 0 }
   0xb   : > { %p6577_p8 = por %p100_p5, %p99_p3  ;;  %p129_p9 = scmp.lt.s32.totalorder %s6508_s14, 3 }
   0xc   : > { %s6583_s22 = scalar_select %p81_p7, %s6496_s11, %s83_s18  }
   0xd   : > { %p130_p10 = pnand %p4934_p6, %p129_p9 }
   0xe   : > { %v6246_v0 = vld [vmem:[%s7491_s1] sm:$0xff] (!%p130_p10)   ;;  %v6510_v2 = vmov (!%p130_p10), 0   ;;  %v6248_v3 = vld [vmem:[%s7491_s1 + $0x8] sm:$0xff] (!%p130_p10)   ;;  %p151_p11 = scmp.lt.s32.totalorder (!%p130_p10), %s6500_s12, 1  ;;  %v6250_v5 = vld [vmem:[%s7491_s1 + $0x10] sm:$0xff] (!%p130_p10)   ;;  %vm328_vm2 = vcmask (!%p130_p10), 31744  }
   0xf   : > { %133 = sbr.rel (%p130_p10) target bundleno = 604 (0x25c), region = 28  ;;  %v6247_v1 = vld [vmem:[%s7491_s1 + $0x100] sm:$0xff] (!%p130_p10)   ;;  %162 = vst [vmem:[#allocation2] sm:$0xf] (!%p130_p10), %v6510_v2  ;;  %163 = vst [vmem:[#allocation2 + $0x4] sm:$0xf] (!%p130_p10), %v6510_v2  ;;  %5483 = vmatprep.subr.bf16.mxu1 (!%p130_p10), %v6246_v0 }
  0x10   : > { %164 = vst [vmem:[#allocation2 + $0x8] sm:$0x1] (!%p130_p10), %v6510_v2  ;;  %165 = vst [vmem:[#allocation2 + $0xc] sm:$0xf] (!%p130_p10), %v6510_v2  ;;  %5484 = vmatpush3.bf16.msra.mxu1 (!%p130_p10), %v6246_v0  ;;  %5675 = vmatprep.subr.bf16.mxu0 (!%p130_p10), %v6247_v1  ;;  %v6249_v4 = vld [vmem:[%s7491_s1 + $0x108] sm:$0xff] (!%p130_p10)   ;;  %v6251_v6 = vld [vmem:[%s7491_s1 + $0x110] sm:$0xff] (!%p130_p10)  }
  0x11   : > { %166 = vst [vmem:[#allocation2 + $0x10] sm:$0xf] (!%p130_p10), %v6510_v2  ;;  %167 = vst [vmem:[#allocation2 + $0x14] sm:$0x1] (!%p130_p10), %v6510_v2  ;;  %5485 = vmatprep.subr.bf16.mxu1 (!%p130_p10), %v6248_v3  ;;  %5676 = vmatpush3.bf16.msra.mxu0 (!%p130_p10), %v6247_v1  ;;  %v6252_v7 = vld [vmem:[%s7491_s1 + $0x18] sm:$0xff] (!%p130_p10)   ;;  %v6254_v9 = vld [vmem:[%s7491_s1 + $0x20] sm:$0xff] (!%p130_p10)  }
  0x12   : > { %168 = vst [vmem:[#allocation2 + $0x18] sm:$0xf] (!%p130_p10), %v6510_v2  ;;  %169 = vst [vmem:[#allocation2 + $0x1c] sm:$0xf] (!%p130_p10), %v6510_v2  ;;  %5677 = vmatprep.subr.bf16.mxu0 (!%p130_p10), %v6249_v4  ;;  %v6253_v8 = vld [vmem:[%s7491_s1 + $0x118] sm:$0xff] (!%p130_p10)   ;;  %v6255_v10 = vld [vmem:[%s7491_s1 + $0x120] sm:$0xff] (!%p130_p10)  }
  0x13   : > { %170 = vst [vmem:[#allocation2 + $0x20] sm:$0x1] (!%p130_p10), %v6510_v2  ;;  %171 = vst [vmem:[#allocation2 + $0x24] sm:$0xf] (!%p130_p10), %v6510_v2  ;;  %v6256_v12 = vld [vmem:[%s7491_s1 + $0x28] sm:$0xff] (!%p130_p10)   ;;  %v6511_v16 = vmov (!%p130_p10), -1.0  }
  0x14   : > { %172 = vst [vmem:[#allocation2 + $0x28] sm:$0xf] (!%p130_p10), %v6510_v2  ;;  %173 = vst [vmem:[#allocation2 + $0x2c] sm:$0x1] (!%p130_p10), %v6510_v2  ;;  %5486 = vmatpush3.bf16.msra.mxu1 (!%p130_p10), %v6248_v3  ;;  %v6257_v13 = vld [vmem:[%s7491_s1 + $0x128] sm:$0xff] (!%p130_p10)   ;;  %v6258_v19 = vld [vmem:[%s7491_s1 + $0x30] sm:$0xff] (!%p130_p10)  }
  0x15   : > { %174 = vst [vmem:[#allocation2 + $0x30] sm:$0xf] (!%p130_p10), %v6510_v2  ;;  %175 = vst [vmem:[#allocation2 + $0x34] sm:$0xf] (!%p130_p10), %v6510_v2  ;;  %5487 = vmatprep.subr.bf16.mxu1 (!%p130_p10), %v6250_v5  ;;  %5678 = vmatpush3.bf16.msra.mxu0 (!%p130_p10), %v6249_v4  ;;  %v6259_v20 = vld [vmem:[%s7491_s1 + $0x130] sm:$0xff] (!%p130_p10)   ;;  %vm766_vm4 = vcmask (!%p130_p10), 1043456  }
  0x16   : > { %176 = vst [vmem:[#allocation2 + $0x38] sm:$0x1] %v6510_v2  ;;  %177 = vst [vmem:[#allocation2 + $0x3c] sm:$0xf] %v6510_v2  ;;  %s152_s7 = scalar_select %p151_p11, %s6500_s12, 1  ;;  %5679 = vmatprep.subr.bf16.mxu0 %v6251_v6  ;;  %v6261_v11 = vld [vmem:[#allocation2] sm:$0xff]  }
  0x17   : > { %178 = vst [vmem:[#allocation2 + $0x40] sm:$0xf] %v6510_v2  ;;  %179 = vst [vmem:[#allocation2 + $0x44] sm:$0x1] %v6510_v2  ;;  %5499 = vmatprep.mubr.bf16.mxu1 %v6261_v11  ;;  %vm442_vm3 = vsmask.f32 256 }
  0x18   : > { %180 = vst [vmem:[#allocation2 + $0x48] sm:$0xf] %v6510_v2  ;;  %181 = vst [vmem:[#allocation2 + $0x4c] sm:$0xf] %v6510_v2  ;;  %5488 = vmatpush3.bf16.msra.mxu1 %v6250_v5  ;;  %s5265_s20 = sshll.u32 %s152_s7, 8  ;;  %vm773_vm7 = vcmask 1040384  }
  0x19   : > { %182 = vst [vmem:[#allocation2 + $0x50] sm:$0x1] %v6510_v2  ;;  %183 = vst [vmem:[#allocation2 + $0x54] sm:$0xf] %v6510_v2  ;;  %5489 = vmatprep.subr.bf16.mxu1 %v6252_v7  ;;  %5680 = vmatpush3.bf16.msra.mxu0 %v6251_v6  ;;  %s6620_s29 = scalar_lea.vmem %s7490_s0, %s5265_s20  ;;  %vm443_vm5 = vsmask.f32 4368 }
  0x1a   : > { %184 = vst [vmem:[#allocation2 + $0x58] sm:$0xf] %v6510_v2  ;;  %185 = vst [vmem:[#allocation2 + $0x5c] sm:$0x1] %v6510_v2  ;;  %5681 = vmatprep.subr.bf16.mxu0 %v6253_v8  ;;  %v216_v14 = vld [vmem:[%s6620_s29] sm:$0xff]  ;;  %v217_v15 = vld [vmem:[%s6620_s29 + $0x8] sm:$0xff] }
  0x1b   : > { %186 = vst [vmem:[#allocation2 + $0x60] sm:$0xf] %v6510_v2  ;;  %187 = vst [vmem:[#allocation2 + $0x64] sm:$0xf] %v6510_v2  ;;  %vm248_vm0 = vcmp.gt.f32.partialorder %v216_v14, 0.0  ;;  %vm249_vm1 = vcmp.gt.f32.partialorder %v217_v15, 0.0 }
  0x1c   : > { %188 = vst [vmem:[#allocation2 + $0x68] sm:$0x1] %v6510_v2  ;;  %189 = vst [vmem:[#allocation2 + $0x6c] sm:$0xf] %v6510_v2  ;;  %5490 = vmatpush3.bf16.msra.mxu1 %v6252_v7  ;;  %v280_v17 = vsel %vm248_vm0, 1.0, %v6511_v16  ;;  %v281_v18 = vsel %vm249_vm1, 1.0, %v6511_v16 }
  0x1d   : > { %190 = vst [vmem:[#allocation2 + $0x70] sm:$0xf] %v6510_v2  ;;  %191 = vst [vmem:[#allocation2 + $0x74] sm:$0x1] %v6510_v2  ;;  %5491 = vmatprep.subr.bf16.mxu1 %v6254_v9  ;;  %5682 = vmatpush3.bf16.msra.mxu0 %v6253_v8  ;;  %v312_v21 = vpack.c.bf16 %v281_v18, %v280_v17  ;;  %vm767_vm6 = vsmask.f32 7938 }
  0x1e   : > { %192 = vst [vmem:[#allocation2 + $0x78] sm:$0xf] %v6510_v2  ;;  %193 = vst [vmem:[#allocation2 + $0x7c] sm:$0xf] %v6510_v2  ;;  %5683 = vmatprep.subr.bf16.mxu0 %v6255_v10  ;;  %v218_v23 = vld [vmem:[%s6620_s29 + $0x10] sm:$0xff]  ;;  %v219_v24 = vld [vmem:[%s6620_s29 + $0x18] sm:$0xff] }
  0x1f   : > { %194 = vst [vmem:[#allocation2 + $0x80] sm:$0x1] %v6510_v2  ;;  %195 = vst [vmem:[#allocation2 + $0x84] sm:$0xf] %v6510_v2  ;;  %v331_v22 = vsel %vm328_vm2, %v312_v21, 0  ;;  %vm250_vm8 = vcmp.gt.f32.partialorder %v218_v23, 0.0 }
  0x20   : > { %196 = vst [vmem:[#allocation2 + $0x88] sm:$0xf] %v6510_v2  ;;  %197 = vst [vmem:[#allocation2 + $0x8c] sm:$0x1] %v6510_v2  ;;  %5492 = vmatpush3.bf16.msra.mxu1 %v6254_v9  ;;  %v4938_v25 = vcombine.low %v331_v22, %v331_v22  ;;  %v4939_v26 = vcombine.high %v331_v22, %v331_v22  ;;  %vm251_vm9 = vcmp.gt.f32.partialorder %v219_v24, 0.0  ;;  %v6260_v27 = vld [vmem:[%s7491_s1 + $0x38] sm:$0xff]  }
  0x21   : > { %198 = vst [vmem:[#allocation2 + $0x90] sm:$0xf] %v6510_v2  ;;  %199 = vst [vmem:[#allocation2 + $0x94] sm:$0xf] %v6510_v2  ;;  %5493 = vmatprep.subr.bf16.mxu1 %v6256_v12  ;;  %5684 = vmatpush3.bf16.msra.mxu0 %v6255_v10  ;;  %v282_v28 = vsel %vm250_vm8, 1.0, %v6511_v16  ;;  %v283_v29 = vsel %vm251_vm9, 1.0, %v6511_v16 }
  0x22   : > { %200 = vst [vmem:[#allocation2 + $0x98] sm:$0x1] %v6510_v2  ;;  %201 = vst [vmem:[#allocation2 + $0x9c] sm:$0xf] %v6510_v2  ;;  %5685 = vmatprep.subr.bf16.mxu0 %v6257_v13  ;;  %v220_v30 = vld [vmem:[%s6620_s29 + $0x20] sm:$0xff]  ;;  %v6262_v31 = vld [vmem:[%s7491_s1 + $0x138] sm:$0xff]   ;;  %v313_v40 = vpack.c.bf16 %v283_v29, %v282_v28 }
  0x23   : > { %202 = vst [vmem:[#allocation2 + $0xa0] sm:$0xf] %v6510_v2  ;;  %203 = vst [vmem:[#allocation2 + $0xa4] sm:$0x1] %v6510_v2  ;;  %v446_v33 = vshrl.u32 %v4938_v25, 16  ;;  %v449_v34 = vshll.u32 %v4938_v25, 16 }
  0x24   : > { %204 = vst [vmem:[#allocation2 + $0xa8] sm:$0xf] %v6510_v2  ;;  %205 = vst [vmem:[#allocation2 + $0xac] sm:$0xf] %v6510_v2  ;;  %5494 = vmatpush3.bf16.msra.mxu1 %v6256_v12  ;;  %v454_v35 = vshrl.u32 %v4939_v26, 16  ;;  %v457_v36 = vshll.u32 %v4939_v26, 16 }
  0x25   : > { %206 = vst [vmem:[#allocation2 + $0xb0] sm:$0x1] %v6510_v2  ;;  %207 = vst [vmem:[#allocation2 + $0xb4] sm:$0xf] %v6510_v2  ;;  %5495 = vmatprep.subr.bf16.mxu1 %v6258_v19  ;;  %5686 = vmatpush3.bf16.msra.mxu0 %v6257_v13  ;;  %v221_v37 = vld [vmem:[%s6620_s29 + $0x28] sm:$0xff]  ;;  %vm252_vm12 = vcmp.gt.f32.partialorder %v220_v30, 0.0 }
  0x26   : > { %208 = vst [vmem:[#allocation2 + $0xb8] sm:$0xf] %v6510_v2  ;;  %209 = vst [vmem:[#allocation2 + $0xbc] sm:$0x1] %v6510_v2  ;;  %5687 = vmatprep.subr.bf16.mxu0 %v6259_v20  ;;  %v769_v39 = vld [vmem:[#allocation2 + $0xc] sm:$0xf] }
  0x27   : > { %210 = vst [vmem:[#allocation2 + $0xc0] sm:$0xf] %v6510_v2  ;;  %211 = vst [vmem:[#allocation2 + $0xc4] sm:$0xf] %v6510_v2  ;;  %vm253_vm13 = vcmp.gt.f32.partialorder %v221_v37, 0.0  ;;  %v448_v41 = vrot.slane %v446_v33, 7 }
  0x28   : > { %212 = vst [vmem:[#allocation2 + $0xc8] sm:$0x1] %v6510_v2  ;;  %213 = vst [vmem:[#allocation2 + $0xcc] sm:$0xf] %v6510_v2  ;;  %5496 = vmatpush3.bf16.msra.mxu1 %v6258_v19  ;;  %v456_v42 = vrot.slane %v454_v35, 7  ;;  %v284_v44 = vsel %vm252_vm12, 1.0, %v6511_v16 }
  0x29   : > { %214 = vst [vmem:[#allocation2 + $0xd0] sm:$0xf] %v6510_v2  ;;  %215 = vst [vmem:[#allocation2 + $0xd4] sm:$0x1] %v6510_v2  ;;  %v285_v45 = vsel %vm253_vm13, 1.0, %v6511_v16  ;;  %5497 = vmatprep.subr.bf16.mxu1 %v6260_v27  ;;  %5688 = vmatpush3.bf16.msra.mxu0 %v6259_v20  ;;  %v6674_v46 = vld [vmem:[%s7491_s1 + $0x40] sm:$0xff]   ;;  %v451_v50 = vor.u32 %v449_v34, %v448_v41 }
  0x2a   : > { %vm6652_vm10 = vmor %vm442_vm3, %vm443_vm5  ;;  %v775_v47 = vld [vmem:[#allocation2 + $0x14] sm:$0x1]  ;;  %v333_v48 = vsel %vm328_vm2, %v313_v40, 0  ;;  %v314_v49 = vpack.c.bf16 %v285_v45, %v284_v44  ;;  %5689 = vmatprep.subr.bf16.mxu0 %v6262_v31  ;;  %v452_v51 = vrot.slane %v448_v41, 4  ;;  %v459_v52 = vor.u32 %v457_v36, %v456_v42  ;;  %v6680_v54 = vld [vmem:[%s7491_s1 + $0x140] sm:$0xff]   ;;  %s148_s28 = sand.u32 1, %s6492_s10  }
  0x2b   : > { %vm6659_vm11 = vmand %vm766_vm4, %vm767_vm6  ;;  %v461_v53 = vrot.slane %v456_v42, 4  ;;  %v222_v55 = vld [vmem:[%s6620_s29 + $0x30] sm:$0xff]  ;;  %v4940_v56 = vcombine.low %v333_v48, %v333_v48  ;;  %v4941_v57 = vcombine.high %v333_v48, %v333_v48  ;;  %v223_v59 = vld [vmem:[%s6620_s29 + $0x38] sm:$0xff]  ;;  %vm1247_vm1 = vsmask.f32 7424  ;;  %s4935_s30 = sshll.u32 %s148_s28, 8 }
  0x2c   : > { %vm6665_vm14 = vmand %vm773_vm7, %vm442_vm3  ;;  %v335_v58 = vsel %vm328_vm2, %v314_v49, 0  ;;  %vm254_vm15 = vcmp.gt.f32.partialorder %v222_v55, 0.0  ;;  %5498 = vmatpush3.bf16.msra.mxu1 %v6260_v27  ;;  %v460_v60 = vsel %vm6652_vm10, %v452_v51, %v459_v52  ;;  %v770_v61 = vsel %vm6659_vm11, %v451_v50, %v769_v39  ;;  %v778_v4 = vld [vmem:[#allocation2 + $0x18] sm:$0xf]  ;;  %v782_v5 = vld [vmem:[#allocation2 + $0x20] sm:$0x1] }
  0x2d   : > { %v776_v62 = vsel %vm6665_vm14, %v461_v53, %v775_v47  ;;  %v4942_v63 = vcombine.low %v335_v58, %v335_v58  ;;  %771 = vst [vmem:[#allocation2 + $0xc] sm:$0xf] %v770_v61  ;;  %772 = vst [vmem:[#allocation2 + $0x10] sm:$0xf] %v460_v60  ;;  %5690 = vmatpush3.bf16.msra.mxu0 %v6262_v31  ;;  %5531 = vmatprep.subr.bf16.mxu1 %v6674_v46  ;;  %v463_v0 = vshrl.u32 %v4940_v56, 16  ;;  %v6273_v26 = vld [vmem:[%s7491_s1 + $0x48] sm:$0xff]  }
  0x2e   : > { %777 = vst [vmem:[#allocation2 + $0x14] sm:$0x1] %v776_v62  ;;  %v466_v1 = vshll.u32 %v4940_v56, 16  ;;  %v471_v2 = vshrl.u32 %v4941_v57, 16  ;;  %v474_v3 = vshll.u32 %v4941_v57, 16  ;;  %5723 = vmatprep.subr.bf16.mxu0 %v6680_v54  ;;  %v4943_v6 = vcombine.high %v335_v58, %v335_v58  ;;  %v224_v34 = vld [vmem:[%s6620_s29 + $0x40] sm:$0xff] }
  0x2f   : > { %v480_v7 = vshrl.u32 %v4942_v63, 16  ;;  %v483_v8 = vshll.u32 %v4942_v63, 16  ;;  %vm255_vm0 = vcmp.gt.f32.partialorder %v223_v59, 0.0  ;;  %v465_v9 = vrot.slane %v463_v0, 7  ;;  %v785_v22 = vld [vmem:[#allocation2 + $0x24] sm:$0xf] }
  0x30   : > { %v473_v10 = vrot.slane %v471_v2, 7  ;;  %v286_v11 = vsel %vm254_vm15, 1.0, %v6511_v16  ;;  %v287_v12 = vsel %vm255_vm0, 1.0, %v6511_v16  ;;  %v488_v14 = vshrl.u32 %v4943_v6, 16  ;;  %v789_v31 = vld [vmem:[#allocation2 + $0x2c] sm:$0x1] }
  0x31   : > { %v482_v13 = vrot.slane %v480_v7, 7  ;;  %v491_v15 = vshll.u32 %v4943_v6, 16  ;;  %v315_v17 = vpack.c.bf16 %v287_v12, %v286_v11  ;;  %v468_v18 = vor.u32 %v466_v1, %v465_v9  ;;  %v225_v35 = vld [vmem:[%s6620_s29 + $0x48] sm:$0xff]  ;;  %v6711_v42 = vld [vmem:[%s6620_s29 + $0x50] sm:$0xff]  ;;  %v796_v2 = vld [vmem:[#allocation2 + $0x38] sm:$0x1] }
  0x32   : > { %v469_v19 = vrot.slane %v465_v9, 4  ;;  %v476_v20 = vor.u32 %v474_v3, %v473_v10  ;;  %v478_v21 = vrot.slane %v473_v10, 4  ;;  %v490_v25 = vrot.slane %v488_v14, 7  ;;  %v6282_v51 = vld [vmem:[%s7491_s1 + $0x50] sm:$0xff]   ;;  %v6728_v9 = vld [vmem:[%s6620_s29 + $0x60] sm:$0xff]  ;;  %s7399_s3 = scalar_lea.vmem [#allocation5], %s4935_s30 }
  0x33   : > { %v485_v23 = vor.u32 %v483_v8, %v482_v13  ;;  %v486_v24 = vrot.slane %v482_v13, 4  ;;  %v337_v27 = vsel %vm328_vm2, %v315_v17, 0  ;;  %v779_v29 = vsel %vm6659_vm11, %v468_v18, %v778_v4  ;;  %v792_v60 = vld [vmem:[#allocation2 + $0x30] sm:$0xf]  ;;  %v227_v8 = vld [vmem:[%s6620_s29 + $0x58] sm:$0xff]  ;;  %s5266_s4 = sshll.u32 %s6500_s12, 12 }
  0x34   : > { %v477_v28 = vsel %vm6652_vm10, %v469_v19, %v476_v20  ;;  %v783_v30 = vsel %vm6665_vm14, %v478_v21, %v782_v5  ;;  %v4944_v33 = vcombine.low %v337_v27, %v337_v27  ;;  %v6263_v36 = vld [vmem:[#allocation2 + $0xc] sm:$0xff]   ;;  %780 = vst [vmem:[#allocation2 + $0x18] sm:$0xf] %v779_v29  ;;  %v493_v37 = vor.u32 %v491_v15, %v490_v25  ;;  %s4855_s5 = sshll.u32 %s7399_s3, 4  ;;  %s7435_s8 = scalar_lea.hbm %s7492_s2, %s5266_s4  ;;  %s7437_s5 = int_to_ptr.vmem [resolvable:$true] %s4855_s5 }
  0x35   : > { %781 = vst [vmem:[#allocation2 + $0x1c] sm:$0xf] %v477_v28  ;;  %784 = vst [vmem:[#allocation2 + $0x20] sm:$0x1] %v783_v30  ;;  %v786_v39 = vsel %vm6659_vm11, %v485_v23, %v785_v22  ;;  %v495_v40 = vrot.slane %v490_v25, 4  ;;  %v4945_v41 = vcombine.high %v337_v27, %v337_v27  ;;  %5500 = vmatmul.mubr.bf16.vlgmr.msra.gmra.mrb[0].mxu1 %v6263_v36  ;;  %v6265_v44 = vld [vmem:[#allocation2 + $0xc] sm:$0xff]  }
  0x36   : > { %787 = vst [vmem:[#allocation2 + $0x24] sm:$0xf] %v786_v39  ;;  %v6266_v45 = vld [vmem:[#allocation2 + $0x14] ss:$0 sps:$4 sm:$0x11]   ;;  %v494_v47 = vsel %vm6652_vm10, %v486_v24, %v493_v37  ;;  %v497_v49 = vshrl.u32 %v4944_v33, 16  ;;  %5532 = vmatpush3.bf16.msra.mxu1 %v6674_v46 }
  0x37   : > { %v790_v48 = vsel %vm6665_vm14, %v495_v40, %v789_v31  ;;  %v500_v50 = vshll.u32 %v4944_v33, 16  ;;  %788 = vst [vmem:[#allocation2 + $0x28] sm:$0xf] %v494_v47  ;;  %v505_v52 = vshrl.u32 %v4945_v41, 16  ;;  %v508_v53 = vshll.u32 %v4945_v41, 16  ;;  %5533 = vmatprep.subr.bf16.mxu1 %v6273_v26  ;;  %v229_v20 = vld [vmem:[%s6620_s29 + $0x68] sm:$0xff] }
  0x38   : > { %791 = vst [vmem:[#allocation2 + $0x2c] sm:$0x1] %v790_v48  ;;  %vm256_vm3 = vcmp.gt.f32.partialorder %v224_v34, 0.0  ;;  %vm257_vm4 = vcmp.gt.f32.partialorder %v225_v35, 0.0  ;;  %v1261_v55 = vshrl.u32 %v6265_v44, 16  ;;  %v1263_v56 = vshll.u32 %v6265_v44, 16 }
  0x39   : > { %v1268_v57 = vshll.u32 %v6266_v45, 16  ;;  %v499_v58 = vrot.slane %v497_v49, 7  ;;  %v507_v59 = vrot.slane %v505_v52, 7  ;;  %v288_v61 = vsel %vm256_vm3, 1.0, %v6511_v16  ;;  %v6291_v33 = vld [vmem:[%s7491_s1 + $0x58] sm:$0xff]   ;;  %v6271_v34 = vld [vmem:[%s7491_s1 + $0x148] sm:$0xff]  }
  0x3a   : > { %v289_v62 = vsel %vm257_vm4, 1.0, %v6511_v16  ;;  %vm258_vm5 = vcmp.gt.f32.partialorder %v6711_v42, 0.0  ;;  %v1265_v46 = vrot.slane %v1263_v56, 1  ;;  %5534 = vmatpush3.bf16.msra.mxu1 %v6273_v26  ;;  %vm259_vm6 = vcmp.gt.f32.partialorder %v227_v8, 0.0  ;;  %v6276_v42 = vld [vmem:[%s7491_s1 + $0x150] sm:$0xff]   ;;  %s7444_s12 = scalar_lea.sflag [#allocation6], %s148_s28 }
  0x3b   : > { %v1270_v63 = vrot.slane %v1268_v57, 1  ;;  %v502_v0 = vor.u32 %v500_v50, %v499_v58  ;;  %v503_v1 = vrot.slane %v499_v58, 4  ;;  %v510_v3 = vor.u32 %v508_v53, %v507_v59  ;;  %5535 = vmatprep.subr.bf16.mxu1 %v6282_v51  ;;  %s6430_s15 = scalar_lea.vmem %s7437_s5, 4096  ;;  %s6512_s16 = smov [#allocation5]  }
  0x3c   : > { %v1266_v4 = vor.u32 %v1265_v46, %v1261_v55  ;;  %v6268_v5 = vld [vmem:[#allocation2 + $0x18] sm:$0xff]   ;;  %v6269_v6 = vld [vmem:[#allocation2 + $0x20] ss:$0 sps:$4 sm:$0x11]   ;;  %v512_v12 = vrot.slane %v507_v59, 4  ;;  %v316_v13 = vpack.c.bf16 %v289_v62, %v288_v61  ;;  %v290_v27 = vsel %vm258_vm5, 1.0, %v6511_v16  ;;  %p6431_p12 = scmp.ne.s32.totalorder %s7437_s5, %s6430_s15 }
  0x3d   : > { %v793_v7 = vsel %vm6659_vm11, %v502_v0, %v792_v60  ;;  %v6270_v10 = vld [vmem:[#allocation2 + $0x18] sm:$0xff]   ;;  %v511_v11 = vsel %vm6652_vm10, %v503_v1, %v510_v3  ;;  %v1273_v15 = vshrl.u32 %v6268_v5, 16  ;;  %v1275_v17 = vshll.u32 %v6268_v5, 16  ;;  %s6434_s18 = sshll.u32 %s6512_s16, 4  ;;  %s6435_s18 = int_to_ptr.vmem [resolvable:$false] %s6434_s18 }
  0x3e   : > { %794 = vst [vmem:[#allocation2 + $0x30] sm:$0xf] %v793_v7  ;;  %v6733_v14 = vsel %vm1247_vm1, %v1266_v4, %v1270_v63  ;;  %v1280_v18 = vshll.u32 %v6269_v6, 16  ;;  %v6272_v19 = vld [vmem:[#allocation2 + $0x24] sm:$0xff]   ;;  %795 = vst [vmem:[#allocation2 + $0x34] sm:$0xf] %v511_v11  ;;  %5503 = vmatprep.mubr.bf16.mxu1 %v6270_v10  ;;  %v797_v21 = vsel %vm6665_vm14, %v512_v12, %v796_v2  ;;  %5536 = vmatpush3.bf16.msra.mxu1 %v6282_v51  ;;  %p6432_p13 = pnand %p6431_p12, %p6570_p4  ;;  %p6437_p1 = scmp.lt.s32.totalorder %s7437_s5, %s6435_s18 }
  0x3f   : > { %5691 = vmatprep.mubr.bf16.mxu0 %v6733_v14  ;;  %v1277_v22 = vrot.slane %v1275_v17, 1  ;;  %5504 = vmatmul.mubr.bf16.gmra.mrb[4].mxu1 %v6272_v19  ;;  %v6274_v24 = vld [vmem:[#allocation2 + $0x24] sm:$0xff]   ;;  %v6275_v25 = vld [vmem:[#allocation2 + $0x2c] ss:$0 sps:$4 sm:$0x11]   ;;  %v339_v26 = vsel %vm328_vm2, %v316_v13, 0 }
  0x40   : > { %v1282_v23 = vrot.slane %v1280_v18, 1  ;;  %798 = vst [vmem:[#allocation2 + $0x38] sm:$0x1] %v797_v21  ;;  %vm260_vm7 = vcmp.gt.f32.partialorder %v6728_v9, 0.0  ;;  %v1285_v29 = vshrl.u32 %v6274_v24, 16  ;;  %v1287_v30 = vshll.u32 %v6274_v24, 16  ;;  %5537 = vmatprep.subr.bf16.mxu1 %v6291_v33  ;;  %p6433_p0 = pneg %p6432_p13 }
  0x41   : > { %v1278_v28 = vor.u32 %v1277_v22, %v1273_v15  ;;  %v1292_v31 = vshll.u32 %v6275_v25, 16  ;;  %v4946_v35 = vcombine.low %v339_v26, %v339_v26  ;;  %v4947_v36 = vcombine.high %v339_v26, %v339_v26  ;;  %v799_v61 = vld [vmem:[#allocation2 + $0x3c] sm:$0xf]  ;;  %v803_v4 = vld [vmem:[#allocation2 + $0x44] sm:$0x1]  ;;  %v230_v10 = vld [vmem:[%s6620_s29 + $0x70] sm:$0xff] }
  0x42   : > { %v291_v37 = vsel %vm259_vm6, 1.0, %v6511_v16  ;;  %vm261_vm8 = vcmp.gt.f32.partialorder %v229_v20, 0.0  ;;  %v1289_v40 = vrot.slane %v1287_v30, 1  ;;  %5538 = vmatpush3.bf16.msra.mxu1 %v6291_v33  ;;  %v292_v46 = vsel %vm260_vm7, 1.0, %v6511_v16  ;;  %v231_v11 = vld [vmem:[%s6620_s29 + $0x78] sm:$0xff]  ;;  %v6779_v17 = vld [vmem:[%s6620_s29 + $0x80] sm:$0xff] }
  0x43   : > { %v6752_v39 = vsel %vm1247_vm1, %v1278_v28, %v1282_v23  ;;  %v1294_v41 = vrot.slane %v1292_v31, 1  ;;  %v514_v45 = vshrl.u32 %v4946_v35, 16  ;;  %v317_v47 = vpack.c.bf16 %v291_v37, %v290_v27  ;;  %v6782_v18 = vld [vmem:[%s6620_s29 + $0x88] sm:$0xff]  ;;  %v6300_v23 = vld [vmem:[%s7491_s1 + $0x60] sm:$0xff]   ;;  %s6436_s20 = scalar_lea.vmem %s6435_s18, 8192 }
  0x44   : > { %5692 = vmatmul.mubr.bf16.vlgmr.msra.gmra.mrb[0].mxu0 %v6752_v39  ;;  %v1290_v48 = vor.u32 %v1289_v40, %v1285_v29  ;;  %v517_v50 = vshll.u32 %v4946_v35, 16  ;;  %v522_v51 = vshrl.u32 %v4947_v36, 16  ;;  %v525_v52 = vshll.u32 %v4947_v36, 16  ;;  %v6285_v25 = vld [vmem:[%s7491_s1 + $0x160] sm:$0xff]   ;;  %v806_v27 = vld [vmem:[#allocation2 + $0x48] sm:$0xf]  ;;  %5539 = vmatprep.subr.bf16.mxu1 %v6300_v23  ;;  %p6438_p2 = scmp.lt.s32.totalorder %s6436_s20, %s6430_s15 }
  0x45   : > { %v6277_v44 = vld [vmem:[#allocation2 + $0x30] sm:$0xff]   ;;  %5724 = vmatpush3.bf16.msra.mxu0 %v6680_v54  ;;  %v516_v58 = vrot.slane %v514_v45, 7  ;;  %v6280_v54 = vld [vmem:[%s7491_s1 + $0x158] sm:$0xff]   ;;  %v341_v62 = vsel %vm328_vm2, %v317_v47, 0  ;;  %v293_v63 = vsel %vm261_vm8, 1.0, %v6511_v16  ;;  %vm262_vm9 = vcmp.gt.f32.partialorder %v230_v10, 0.0 }
  0x46   : > { %v6279_v49 = vld [vmem:[#allocation2 + $0x30] sm:$0xff]   ;;  %5725 = vmatprep.subr.bf16.mxu0 %v6271_v34  ;;  %v1297_v55 = vshrl.u32 %v6277_v44, 16  ;;  %v6760_v56 = vsel %vm1247_vm1, %v1290_v48, %v1294_v41  ;;  %v1299_v57 = vshll.u32 %v6277_v44, 16  ;;  %v524_v59 = vrot.slane %v522_v51, 7  ;;  %5540 = vmatpush3.bf16.msra.mxu1 %v6300_v23  ;;  %v6289_v51 = vld [vmem:[%s7491_s1 + $0x168] sm:$0xff]   ;;  %p6439_p3 = por %p6438_p2, %p6437_p1 }
  0x47   : > { %v6278_v53 = vld [vmem:[#allocation2 + $0x38] ss:$0 sps:$4 sm:$0x11]   ;;  %5507 = vmatprep.mubr.bf16.mxu1 %v6279_v49  ;;  %5695 = vmatprep.mubr.bf16.mxu0 %v6760_v56  ;;  %v519_v1 = vor.u32 %v517_v50, %v516_v58  ;;  %v520_v2 = vrot.slane %v516_v58, 4  ;;  %v4948_v7 = vcombine.low %v341_v62, %v341_v62  ;;  %v4949_v8 = vcombine.high %v341_v62, %v341_v62 }
  0x48   : > { %v1304_v60 = vshll.u32 %v6278_v53, 16  ;;  %v1301_v0 = vrot.slane %v1299_v57, 1  ;;  %v527_v3 = vor.u32 %v525_v52, %v524_v59  ;;  %v529_v6 = vrot.slane %v524_v59, 4  ;;  %v813_v57 = vld [vmem:[#allocation2 + $0x54] sm:$0xf]  ;;  %p6440_p5 = pnand %p6439_p3, %p6433_p0 }
  0x49   : > { %5726 = vmatpush3.bf16.msra.mxu0 %v6271_v34  ;;  %v800_v13 = vsel %vm6659_vm11, %v519_v1, %v799_v61  ;;  %v318_v15 = vpack.c.bf16 %v293_v63, %v292_v46  ;;  %v531_v20 = vshrl.u32 %v4948_v7, 16  ;;  %v534_v21 = vshll.u32 %v4948_v7, 16  ;;  %v810_v34 = vld [vmem:[#allocation2 + $0x50] sm:$0x1]  ;;  %v817_v46 = vld [vmem:[#allocation2 + $0x5c] sm:$0x1] }
  0x4a   : > { %5727 = vmatprep.subr.bf16.mxu0 %v6276_v42  ;;  %v1306_v5 = vrot.slane %v1304_v60, 1  ;;  %v1302_v9 = vor.u32 %v1301_v0, %v1297_v55  ;;  %v528_v12 = vsel %vm6652_vm10, %v520_v2, %v527_v3  ;;  %801 = vst [vmem:[#allocation2 + $0x3c] sm:$0xf] %v800_v13  ;;  %v804_v19 = vsel %vm6665_vm14, %v529_v6, %v803_v4  ;;  %v6294_v63 = vld [vmem:[%s7491_s1 + $0x170] sm:$0xff]  }
  0x4b   : > { %802 = vst [vmem:[#allocation2 + $0x40] sm:$0xf] %v528_v12  ;;  %v539_v22 = vshrl.u32 %v4949_v8, 16  ;;  %805 = vst [vmem:[#allocation2 + $0x44] sm:$0x1] %v804_v19  ;;  %v542_v26 = vshll.u32 %v4949_v8, 16 }
  0x4c   : > { %v6790_v24 = vsel %vm1247_vm1, %v1302_v9, %v1306_v5  ;;  %v343_v28 = vsel %vm328_vm2, %v318_v15, 0  ;;  %v533_v29 = vrot.slane %v531_v20, 7  ;;  %vm263_vm12 = vcmp.gt.f32.partialorder %v231_v11, 0.0  ;;  %v6298_v15 = vld [vmem:[%s7491_s1 + $0x178] sm:$0xff]  }
  0x4d   : > { %5728 = vmatpush3.bf16.msra.mxu0 %v6276_v42  ;;  %v541_v30 = vrot.slane %v539_v22, 7  ;;  %v4950_v31 = vcombine.low %v343_v28, %v343_v28  ;;  %v4951_v33 = vcombine.high %v343_v28, %v343_v28  ;;  %v294_v35 = vsel %vm262_vm9, 1.0, %v6511_v16 }
  0x4e   : > { %5696 = vmatmul.mubr.bf16.gmra.mrb[4].mxu0 %v6790_v24  ;;  %5729 = vmatprep.subr.bf16.mxu0 %v6280_v54  ;;  %vm264_vm13 = vcmp.gt.f32.partialorder %v6779_v17, 0.0  ;;  %vm265_vm15 = vcmp.gt.f32.partialorder %v6782_v18, 0.0  ;;  %v536_v36 = vor.u32 %v534_v21, %v533_v29  ;;  %v537_v37 = vrot.slane %v533_v29, 4  ;;  %v6308_v17 = vld [vmem:[%s7491_s1 + $0x68] sm:$0xff]  }
  0x4f   : > { %v544_v40 = vor.u32 %v542_v26, %v541_v30  ;;  %v546_v41 = vrot.slane %v541_v30, 4  ;;  %v548_v42 = vshrl.u32 %v4950_v31, 16  ;;  %v551_v44 = vshll.u32 %v4950_v31, 16  ;;  %5541 = vmatprep.subr.bf16.mxu1 %v6308_v17 }
  0x50   : > { %v556_v45 = vshrl.u32 %v4951_v33, 16  ;;  %v559_v47 = vshll.u32 %v4951_v33, 16  ;;  %v807_v49 = vsel %vm6659_vm11, %v536_v36, %v806_v27  ;;  %v295_v52 = vsel %vm263_vm12, 1.0, %v6511_v16  ;;  %5542 = vmatpush3.bf16.msra.mxu1 %v6308_v17  ;;  %v820_v33 = vld [vmem:[#allocation2 + $0x60] sm:$0xf] }
  0x51   : > { %5730 = vmatpush3.bf16.msra.mxu0 %v6280_v54  ;;  %v545_v48 = vsel %vm6652_vm10, %v537_v37, %v544_v40  ;;  %v811_v50 = vsel %vm6665_vm14, %v546_v41, %v810_v34  ;;  %808 = vst [vmem:[#allocation2 + $0x48] sm:$0xf] %v807_v49  ;;  %v550_v55 = vrot.slane %v548_v42, 7  ;;  %v319_v58 = vpack.c.bf16 %v295_v52, %v294_v35  ;;  %v824_v34 = vld [vmem:[#allocation2 + $0x68] sm:$0x1]  ;;  %v6839_v35 = vld [vmem:[%s7491_s1 + $0x180] sm:$0xff]  }
  0x52   : > { %5731 = vmatprep.subr.bf16.mxu0 %v6285_v25  ;;  %v6281_v53 = vld [vmem:[#allocation2 + $0x3c] sm:$0xff]   ;;  %809 = vst [vmem:[#allocation2 + $0x4c] sm:$0xf] %v545_v48  ;;  %812 = vst [vmem:[#allocation2 + $0x50] sm:$0x1] %v811_v50  ;;  %v558_v62 = vrot.slane %v556_v45, 7 }
  0x53   : > { %5508 = vmatmul.mubr.bf16.gmra.mrb[8].mxu1 %v6281_v53  ;;  %v6283_v59 = vld [vmem:[#allocation2 + $0x3c] sm:$0xff]   ;;  %v6284_v60 = vld [vmem:[#allocation2 + $0x44] ss:$0 sps:$4 sm:$0x11]   ;;  %v553_v54 = vor.u32 %v551_v44, %v550_v55  ;;  %v554_v61 = vrot.slane %v550_v55, 4  ;;  %v345_v0 = vsel %vm328_vm2, %v319_v58, 0 }
  0x54   : > { %v296_v1 = vsel %vm264_vm13, 1.0, %v6511_v16  ;;  %v297_v2 = vsel %vm265_vm15, 1.0, %v6511_v16  ;;  %v1309_v3 = vshrl.u32 %v6283_v59, 16  ;;  %v1311_v4 = vshll.u32 %v6283_v59, 16  ;;  %v6843_v48 = vld [vmem:[#allocation2 + $0xc] sm:$0xfe]  }
  0x55   : > { %5732 = vmatpush3.bf16.msra.mxu0 %v6285_v25  ;;  %v1316_v5 = vshll.u32 %v6284_v60, 16  ;;  %v561_v6 = vor.u32 %v559_v47, %v558_v62  ;;  %v814_v7 = vsel %vm6659_vm11, %v553_v54, %v813_v57  ;;  %v563_v8 = vrot.slane %v558_v62, 4  ;;  %v6845_v53 = vld [vmem:[#allocation2 + $0x14] ss:$0 sps:$4 sm:$0x11]   ;;  %v236_v17 = vld [vmem:[%s6620_s29 + $0xa0] sm:$0xff] }
  0x56   : > { %5733 = vmatprep.subr.bf16.mxu0 %v6289_v51  ;;  %v4952_v10 = vcombine.low %v345_v0, %v345_v0  ;;  %v4953_v11 = vcombine.high %v345_v0, %v345_v0  ;;  %v1313_v9 = vrot.slane %v1311_v4, 1  ;;  %815 = vst [vmem:[#allocation2 + $0x54] sm:$0xf] %v814_v7  ;;  %v320_v19 = vpack.c.bf16 %v297_v2, %v296_v1  ;;  %v6847_v55 = vld [vmem:[#allocation2 + $0x18] sm:$0xfe]  }
  0x57   : > { %v1318_v12 = vrot.slane %v1316_v5, 1  ;;  %v562_v13 = vsel %vm6652_vm10, %v554_v61, %v561_v6  ;;  %v818_v18 = vsel %vm6665_vm14, %v563_v8, %v817_v46  ;;  %vm1699_vm0 = vcmask 1046528   ;;  %v6849_v60 = vld [vmem:[#allocation2 + $0x20] ss:$0 sps:$4 sm:$0x11]   ;;  %v234_v5 = vld [vmem:[%s6620_s29 + $0x90] sm:$0xff] }
  0x58   : > { %816 = vst [vmem:[#allocation2 + $0x58] sm:$0xf] %v562_v13  ;;  %v1314_v20 = vor.u32 %v1313_v9, %v1309_v3  ;;  %819 = vst [vmem:[#allocation2 + $0x5c] sm:$0x1] %v818_v18  ;;  %v565_v25 = vshrl.u32 %v4952_v10, 16  ;;  %v568_v26 = vshll.u32 %v4952_v10, 16 }
  0x59   : > { %5734 = vmatpush3.bf16.msra.mxu0 %v6289_v51  ;;  %v6286_v21 = vld [vmem:[#allocation2 + $0x48] sm:$0xff]   ;;  %v6287_v22 = vld [vmem:[#allocation2 + $0x50] ss:$0 sps:$4 sm:$0x11]   ;;  %v573_v27 = vshrl.u32 %v4953_v11, 16  ;;  %v576_v40 = vshll.u32 %v4953_v11, 16 }
  0x5a   : > { %5735 = vmatprep.subr.bf16.mxu0 %v6294_v63  ;;  %v6288_v23 = vld [vmem:[#allocation2 + $0x48] sm:$0xff]   ;;  %v6834_v28 = vsel %vm1247_vm1, %v1314_v20, %v1318_v12  ;;  %v1321_v29 = vshrl.u32 %v6286_v21, 16  ;;  %v1323_v30 = vshll.u32 %v6286_v21, 16  ;;  %v1328_v31 = vshll.u32 %v6287_v22, 16 }
  0x5b   : > { %5699 = vmatprep.mubr.bf16.mxu0 %v6834_v28  ;;  %5511 = vmatprep.mubr.bf16.mxu1 %v6288_v23  ;;  %v567_v36 = vrot.slane %v565_v25, 7  ;;  %v575_v37 = vrot.slane %v573_v27, 7  ;;  %v347_v41 = vsel %vm328_vm2, %v320_v19, 0  ;;  %v827_v0 = vld [vmem:[#allocation2 + $0x6c] sm:$0xf]  ;;  %v1703_v13 = vrot.slane %v6843_v48, 1 }
  0x5c   : > { %v1325_v42 = vrot.slane %v1323_v30, 1  ;;  %v1330_v44 = vrot.slane %v1328_v31, 1  ;;  %v4954_v45 = vcombine.low %v347_v41, %v347_v41  ;;  %v4955_v47 = vcombine.high %v347_v41, %v347_v41  ;;  %v237_v18 = vld [vmem:[%s6620_s29 + $0xa8] sm:$0xff] }
  0x5d   : > { %5736 = vmatpush3.bf16.msra.mxu0 %v6294_v63  ;;  %v570_v49 = vor.u32 %v568_v26, %v567_v36  ;;  %v571_v50 = vrot.slane %v567_v36, 4  ;;  %v578_v51 = vor.u32 %v576_v40, %v575_v37  ;;  %v580_v52 = vrot.slane %v575_v37, 4  ;;  %v6876_v30 = vld [vmem:[#allocation2 + $0x24] sm:$0xfe]  }
  0x5e   : > { %5737 = vmatprep.subr.bf16.mxu0 %v6298_v15  ;;  %v1326_v57 = vor.u32 %v1325_v42, %v1321_v29  ;;  %v582_v59 = vshrl.u32 %v4954_v45, 16  ;;  %v585_v3 = vshll.u32 %v4954_v45, 16  ;;  %v590_v4 = vshrl.u32 %v4955_v47, 16  ;;  %v6310_v37 = vld [vmem:[#allocation2 + $0x2c] ss:$0 sps:$4 sm:$0x11]  }
  0x5f   : > { %v6290_v58 = vld [vmem:[#allocation2 + $0x54] sm:$0xff]   ;;  %v6293_v61 = vld [vmem:[#allocation2 + $0x5c] ss:$0 sps:$4 sm:$0x11]   ;;  %v579_v62 = vsel %vm6652_vm10, %v571_v50, %v578_v51  ;;  %v821_v46 = vsel %vm6659_vm11, %v570_v49, %v820_v33  ;;  %v825_v63 = vsel %vm6665_vm14, %v580_v52, %v824_v34  ;;  %v593_v10 = vshll.u32 %v4955_v47, 16 }
  0x60   : > { %v6292_v54 = vld [vmem:[#allocation2 + $0x54] sm:$0xff]   ;;  %v6859_v1 = vsel %vm1247_vm1, %v1326_v57, %v1330_v44  ;;  %5512 = vmatmul.mubr.bf16.gmra.mrb[12].mxu1 %v6290_v58  ;;  %822 = vst [vmem:[#allocation2 + $0x60] sm:$0xf] %v821_v46  ;;  %823 = vst [vmem:[#allocation2 + $0x64] sm:$0xf] %v579_v62  ;;  %v584_v2 = vrot.slane %v582_v59, 7 }
  0x61   : > { %5738 = vmatpush3.bf16.msra.mxu0 %v6298_v15  ;;  %826 = vst [vmem:[#allocation2 + $0x68] sm:$0x1] %v825_v63  ;;  %v1333_v6 = vshrl.u32 %v6292_v54, 16  ;;  %v1335_v7 = vshll.u32 %v6292_v54, 16  ;;  %v1340_v8 = vshll.u32 %v6293_v61, 16  ;;  %v6863_v12 = vrot.slane %v590_v4, 7 }
  0x62   : > { %5771 = vmatprep.subr.bf16.mxu0 %v6839_v35  ;;  %5700 = vmatmul.mubr.bf16.gmra.mrb[8].mxu0 %v6859_v1  ;;  %v587_v11 = vor.u32 %v585_v3, %v584_v2  ;;  %v588_v9 = vrot.slane %v584_v2, 4  ;;  %v235_v15 = vld [vmem:[%s6620_s29 + $0x98] sm:$0xff]  ;;  %v1704_v21 = vrot.slane %v6845_v53, 1  ;;  %v1706_v22 = vrot.slane %v6847_v55, 1  ;;  %v6891_v53 = vld [vmem:[#allocation2 + $0x30] sm:$0xfe]  }
  0x63   : > { %v1337_v19 = vrot.slane %v1335_v7, 1  ;;  %v1342_v20 = vrot.slane %v1340_v8, 1  ;;  %v595_v23 = vor.u32 %v593_v10, %v6863_v12  ;;  %v1707_v26 = vrot.slane %v6849_v60, 1  ;;  %v6897_v60 = vld [vmem:[#allocation2 + $0x38] ss:$0 sps:$4 sm:$0x11]  }
  0x64   : > { %v828_v25 = vsel %vm6659_vm11, %v587_v11, %v827_v0  ;;  %vm266_vm3 = vcmp.gt.f32.partialorder %v234_v5, 0.0  ;;  %vm267_vm4 = vcmp.gt.f32.partialorder %v235_v15, 0.0  ;;  %vm268_vm5 = vcmp.gt.f32.partialorder %v236_v17, 0.0  ;;  %v238_v54 = vld [vmem:[%s6620_s29 + $0xb0] sm:$0xff]  ;;  %v834_v4 = vld [vmem:[#allocation2 + $0x78] sm:$0xf] }
  0x65   : > { %v1338_v27 = vor.u32 %v1337_v19, %v1333_v6  ;;  %829 = vst [vmem:[#allocation2 + $0x6c] sm:$0xf] %v828_v25  ;;  %v298_v29 = vsel %vm266_vm3, 1.0, %v6511_v16  ;;  %v596_v31 = vsel %vm6652_vm10, %v588_v9, %v595_v23  ;;  %v299_v33 = vsel %vm267_vm4, 1.0, %v6511_v16  ;;  %v6316_v61 = vld [vmem:[%s7491_s1 + $0x70] sm:$0xff]   ;;  %v240_v19 = vld [vmem:[%s6620_s29 + $0xc0] sm:$0xff] }
  0x66   : > { %vm269_vm6 = vcmp.gt.f32.partialorder %v237_v18, 0.0  ;;  %830 = vst [vmem:[#allocation2 + $0x70] sm:$0xf] %v596_v31  ;;  %v321_v36 = vpack.c.bf16 %v299_v33, %v298_v29  ;;  %v6886_v44 = vsel %vm1699_vm0, %v1703_v13, %v1704_v21  ;;  %v300_v47 = vsel %vm268_vm5, 1.0, %v6511_v16  ;;  %5543 = vmatprep.subr.bf16.mxu1 %v6316_v61  ;;  %v239_v13 = vld [vmem:[%s6620_s29 + $0xb8] sm:$0xff]  ;;  %v241_v31 = vld [vmem:[%s6620_s29 + $0xc8] sm:$0xff] }
  0x67   : > { %v6882_v34 = vsel %vm1247_vm1, %v1338_v27, %v1342_v20  ;;  %v6295_v40 = vld [vmem:[#allocation2 + $0x60] sm:$0xff]   ;;  %v301_v48 = vsel %vm269_vm6, 1.0, %v6511_v16  ;;  %v6894_v55 = vsel %vm1699_vm0, %v1706_v22, %v1707_v26  ;;  %v1709_v59 = vrot.slane %v6876_v30, 1  ;;  %5544 = vmatpush3.bf16.msra.mxu1 %v6316_v61 }
  0x68   : > { %5703 = vmatprep.mubr.bf16.mxu0 %v6882_v34  ;;  %v6296_v41 = vld [vmem:[#allocation2 + $0x68] ss:$0 sps:$4 sm:$0x11]   ;;  %v6297_v42 = vld [vmem:[#allocation2 + $0x60] sm:$0xff]   ;;  %v349_v45 = vsel %vm328_vm2, %v321_v36, 0  ;;  %v1345_v49 = vshrl.u32 %v6295_v40, 16  ;;  %v322_v58 = vpack.c.bf16 %v301_v48, %v300_v47 }
  0x69   : > { %v1347_v50 = vshll.u32 %v6295_v40, 16  ;;  %v1352_v51 = vshll.u32 %v6296_v41, 16  ;;  %v4956_v52 = vcombine.low %v349_v45, %v349_v45  ;;  %5515 = vmatprep.mubr.bf16.mxu1 %v6297_v42  ;;  %v4957_v57 = vcombine.high %v349_v45, %v349_v45  ;;  %v841_v30 = vld [vmem:[#allocation2 + $0x84] sm:$0xf]  ;;  %v6317_v40 = vld [vmem:[#allocation2 + $0x3c] sm:$0xfe]  }
  0x6a   : > { %v351_v5 = vsel %vm328_vm2, %v322_v58, 0  ;;  %v1710_v6 = vrot.slane %v6310_v37, 1  ;;  %v1712_v17 = vrot.slane %v6891_v53, 1  ;;  %v1713_v18 = vrot.slane %v6897_v60, 1  ;;  %v243_v60 = vld [vmem:[%s6620_s29 + $0xd8] sm:$0xff] }
  0x6b   : > { %v1349_v62 = vrot.slane %v1347_v50, 1  ;;  %v1354_v46 = vrot.slane %v1352_v51, 1  ;;  %v599_v63 = vshrl.u32 %v4956_v52, 16  ;;  %v602_v0 = vshll.u32 %v4956_v52, 16 }
  0x6c   : > { %v607_v2 = vshrl.u32 %v4957_v57, 16  ;;  %v610_v3 = vshll.u32 %v4957_v57, 16  ;;  %v4958_v11 = vcombine.low %v351_v5, %v351_v5  ;;  %v4959_v9 = vcombine.high %v351_v5, %v351_v5  ;;  %v6318_v48 = vld [vmem:[#allocation2 + $0x44] ss:$0 sps:$4 sm:$0x11]  }
  0x6d   : > { %v1350_v7 = vor.u32 %v1349_v62, %v1345_v49  ;;  %v6299_v8 = vld [vmem:[#allocation2 + $0x6c] sm:$0xff]   ;;  %v601_v10 = vrot.slane %v599_v63, 7  ;;  %vm270_vm7 = vcmp.gt.f32.partialorder %v238_v54, 0.0  ;;  %v6920_v37 = vsel %vm1699_vm0, %v1709_v59, %v1710_v6 }
  0x6e   : > { %v6905_v15 = vrot.slane %v607_v2, 7  ;;  %5516 = vmatmul.mubr.bf16.gmra.mrb[16].mxu1 %v6299_v8  ;;  %v616_v23 = vshrl.u32 %v4958_v11, 16  ;;  %v619_v26 = vshll.u32 %v4958_v11, 16  ;;  %v624_v27 = vshrl.u32 %v4959_v9, 16  ;;  %v242_v49 = vld [vmem:[%s6620_s29 + $0xd0] sm:$0xff]  ;;  %v244_v11 = vld [vmem:[%s6620_s29 + $0xe0] sm:$0xff] }
  0x6f   : > { %v6911_v20 = vsel %vm1247_vm1, %v1350_v7, %v1354_v46  ;;  %v604_v21 = vor.u32 %v602_v0, %v601_v10  ;;  %v605_v22 = vrot.slane %v601_v10, 4  ;;  %v627_v29 = vshll.u32 %v4959_v9, 16  ;;  %v6311_v0 = vld [vmem:[%s7491_s1 + $0x188] sm:$0xff]  }
  0x70   : > { %5704 = vmatmul.mubr.bf16.gmra.mrb[12].mxu0 %v6911_v20  ;;  %v612_v25 = vor.u32 %v610_v3, %v6905_v15  ;;  %v618_v36 = vrot.slane %v616_v23, 7  ;;  %vm271_vm8 = vcmp.gt.f32.partialorder %v239_v13, 0.0  ;;  %v6924_v42 = vrot.slane %v624_v27, 7  ;;  %v6942_v5 = vld [vmem:[#allocation2 + $0x48] sm:$0xfe]   ;;  %v6319_v23 = vld [vmem:[%s7491_s1 + $0x190] sm:$0xff]  }
  0x71   : > { %5739 = vmatprep.mubr.bf16.mxu0 %v6886_v44  ;;  %v835_v33 = vsel %vm6659_vm11, %v604_v21, %v834_v4  ;;  %v302_v45 = vsel %vm270_vm7, 1.0, %v6511_v16  ;;  %v303_v47 = vsel %vm271_vm8, 1.0, %v6511_v16  ;;  %vm272_vm9 = vcmp.gt.f32.partialorder %v240_v19, 0.0  ;;  %v245_v9 = vld [vmem:[%s6620_s29 + $0xe8] sm:$0xff]  ;;  %v848_v19 = vld [vmem:[#allocation2 + $0x90] sm:$0xf] }
  0x72   : > { %v613_v41 = vsel %vm6652_vm10, %v605_v22, %v612_v25  ;;  %836 = vst [vmem:[#allocation2 + $0x78] sm:$0xf] %v835_v33  ;;  %v621_v50 = vor.u32 %v619_v26, %v618_v36  ;;  %v622_v51 = vrot.slane %v618_v36, 4  ;;  %v323_v52 = vpack.c.bf16 %v303_v47, %v302_v45  ;;  %v6961_v25 = vld [vmem:[#allocation2 + $0x50] ss:$0 sps:$4 sm:$0x11]  }
  0x73   : > { %837 = vst [vmem:[#allocation2 + $0x7c] sm:$0xf] %v613_v41  ;;  %v629_v57 = vor.u32 %v627_v29, %v6924_v42  ;;  %vm273_vm12 = vcmp.gt.f32.partialorder %v241_v31, 0.0  ;;  %v304_v58 = vsel %vm272_vm9, 1.0, %v6511_v16  ;;  %v1715_v59 = vrot.slane %v6317_v40, 1  ;;  %v6324_v29 = vld [vmem:[%s7491_s1 + $0x78] sm:$0xff]  }
  0x74   : > { %v842_v54 = vsel %vm6659_vm11, %v621_v50, %v841_v30  ;;  %v353_v61 = vsel %vm328_vm2, %v323_v52, 0  ;;  %v305_v62 = vsel %vm273_vm12, 1.0, %v6511_v16  ;;  %v1716_v46 = vrot.slane %v6318_v48, 1  ;;  %5545 = vmatprep.subr.bf16.mxu1 %v6324_v29  ;;  %v6327_v45 = vld [vmem:[%s7491_s1 + $0x198] sm:$0xff]   ;;  %v6977_v52 = vld [vmem:[#allocation2] sm:$0xff]  }
  0x75   : > { %v630_v63 = vsel %vm6652_vm10, %v622_v51, %v629_v57  ;;  %843 = vst [vmem:[#allocation2 + $0x84] sm:$0xf] %v842_v54  ;;  %v4960_v2 = vcombine.low %v353_v61, %v353_v61  ;;  %v4961_v3 = vcombine.high %v353_v61, %v353_v61  ;;  %v324_v4 = vpack.c.bf16 %v305_v62, %v304_v58  ;;  %v855_v50 = vld [vmem:[#allocation2 + $0x9c] sm:$0xf]  ;;  %v6990_v61 = vld [vmem:[%s7491_s1 + $0x80] sm:$0xff]  }
  0x76   : > { %844 = vst [vmem:[#allocation2 + $0x88] sm:$0xf] %v630_v63  ;;  %vm274_vm13 = vcmp.gt.f32.partialorder %v242_v49, 0.0  ;;  %vm275_vm15 = vcmp.gt.f32.partialorder %v243_v60, 0.0  ;;  %v6952_v13 = vsel %vm1699_vm0, %v1712_v17, %v1713_v18  ;;  %v6956_v22 = vsel %vm1699_vm0, %v1715_v59, %v1716_v46  ;;  %5546 = vmatpush3.bf16.msra.mxu1 %v6324_v29 }
  0x77   : > { %v633_v6 = vshrl.u32 %v4960_v2, 16  ;;  %v636_v7 = vshll.u32 %v4960_v2, 16  ;;  %v641_v8 = vshrl.u32 %v4961_v3, 16  ;;  %v644_v10 = vshll.u32 %v4961_v3, 16  ;;  %5579 = vmatprep.subr.bf16.mxu1 %v6990_v61 }
  0x78   : > { %5740 = vmatmul.mubr.bf16.vlgmr.msra.gmra.mrb[0].mxu0 %v6894_v55  ;;  %v355_v21 = vsel %vm328_vm2, %v324_v4, 0  ;;  %v1718_v30 = vrot.slane %v6942_v5, 1  ;;  %v307_v31 = vsel %vm275_vm15, 1.0, %v6511_v16  ;;  %vm276_vm3 = vcmp.gt.f32.partialorder %v244_v11, 0.0 }
  0x79   : > { %5772 = vmatpush3.bf16.msra.mxu0 %v6839_v35  ;;  %5743 = vmatprep.mubr.bf16.mxu0 %v6920_v37  ;;  %v306_v35 = vsel %vm274_vm13, 1.0, %v6511_v16  ;;  %v635_v53 = vrot.slane %v633_v6, 7  ;;  %v6965_v17 = vrot.slane %v641_v8, 7  ;;  %v4962_v18 = vcombine.low %v355_v21, %v355_v21  ;;  %v6326_v11 = vld [vmem:[#allocation2 + $0x5c] ss:$0 sps:$4 sm:$0x11]  }
  0x7a   : > { %v6306_v26 = vld [vmem:[#allocation2 + $0x78] sm:$0xff]   ;;  %5773 = vmatprep.subr.bf16.mxu0 %v6311_v0  ;;  %v4963_v27 = vcombine.high %v355_v21, %v355_v21  ;;  %vm277_vm4 = vcmp.gt.f32.partialorder %v245_v9, 0.0  ;;  %v325_v51 = vpack.c.bf16 %v307_v31, %v306_v35  ;;  %v308_v54 = vsel %vm276_vm3, 1.0, %v6511_v16 }
  0x7b   : > { %5519 = vmatprep.mubr.bf16.mxu1 %v6306_v26  ;;  %v638_v33 = vor.u32 %v636_v7, %v635_v53  ;;  %v639_v36 = vrot.slane %v635_v53, 4  ;;  %v646_v40 = vor.u32 %v644_v10, %v6965_v17  ;;  %v650_v41 = vshrl.u32 %v4962_v18, 16  ;;  %v6325_v7 = vld [vmem:[#allocation2 + $0x54] sm:$0xfe]   ;;  %v6335_v26 = vld [vmem:[%s7491_s1 + $0x1a0] sm:$0xff]  }
  0x7c   : > { %v653_v47 = vshll.u32 %v4962_v18, 16  ;;  %v658_v48 = vshrl.u32 %v4963_v27, 16  ;;  %v661_v49 = vshll.u32 %v4963_v27, 16  ;;  %v1719_v46 = vrot.slane %v6961_v25, 1  ;;  %v862_v18 = vld [vmem:[#allocation2 + $0xa8] sm:$0xf] }
  0x7d   : > { %5774 = vmatpush3.bf16.msra.mxu0 %v6311_v0  ;;  %v6979_v57 = vld [vmem:[#allocation2 + $0x84] sm:$0xff]   ;;  %v647_v58 = vsel %vm6652_vm10, %v639_v36, %v646_v40  ;;  %v849_v59 = vsel %vm6659_vm11, %v638_v33, %v848_v19  ;;  %v652_v60 = vrot.slane %v650_v41, 7  ;;  %v357_v63 = vsel %vm328_vm2, %v325_v51, 0 }
  0x7e   : > { %5775 = vmatprep.subr.bf16.mxu0 %v6319_v23  ;;  %850 = vst [vmem:[#allocation2 + $0x90] sm:$0xf] %v849_v59  ;;  %851 = vst [vmem:[#allocation2 + $0x94] sm:$0xf] %v647_v58  ;;  %v6992_v62 = vrot.slane %v658_v48, 7  ;;  %v309_v0 = vsel %vm277_vm4, 1.0, %v6511_v16  ;;  %5520 = vmatmul.mubr.bf16.gmra.mrb[20].mxu1 %v6979_v57  ;;  %v4964_v4 = vcombine.low %v357_v63, %v357_v63 }
  0x7f   : > { %v655_v2 = vor.u32 %v653_v47, %v652_v60  ;;  %v656_v3 = vrot.slane %v652_v60, 4  ;;  %v4965_v6 = vcombine.high %v357_v63, %v357_v63  ;;  %v326_v10 = vpack.c.bf16 %v309_v0, %v308_v54  ;;  %v6341_v41 = vld [vmem:[%s7491_s1 + $0x1a8] sm:$0xff]  }
  0x80   : > { %5744 = vmatmul.mubr.bf16.gmra.mrb[4].mxu0 %v6952_v13  ;;  %v663_v8 = vor.u32 %v661_v49, %v6992_v62  ;;  %v1251_v19 = vshll.u32 %v6977_v52, 16  ;;  %v667_v21 = vshrl.u32 %v4964_v4, 16  ;;  %v670_v25 = vshll.u32 %v4964_v4, 16  ;;  %v6328_v49 = vld [vmem:[#allocation2 + $0x60] sm:$0xfe]  }
  0x81   : > { %5747 = vmatprep.mubr.bf16.mxu0 %v6956_v22  ;;  %5776 = vmatpush3.bf16.msra.mxu0 %v6319_v23  ;;  %v856_v9 = vsel %vm6659_vm11, %v655_v2, %v855_v50  ;;  %v675_v35 = vshrl.u32 %v4965_v6, 16  ;;  %v678_v53 = vshll.u32 %v4965_v6, 16  ;;  %v359_v27 = vsel %vm328_vm2, %v326_v10, 0  ;;  %v6329_v50 = vld [vmem:[#allocation2 + $0x68] ss:$0 sps:$4 sm:$0x11]  }
  0x82   : > { %5777 = vmatprep.subr.bf16.mxu0 %v6327_v45  ;;  %v664_v23 = vsel %vm6652_vm10, %v656_v3, %v663_v8  ;;  %857 = vst [vmem:[#allocation2 + $0x9c] sm:$0xf] %v856_v9  ;;  %v1721_v29 = vrot.slane %v6325_v7, 1  ;;  %v669_v31 = vrot.slane %v667_v21, 7  ;;  %v4966_v36 = vcombine.low %v359_v27, %v359_v27  ;;  %v6362_v32 = vld [vmem:[#allocation2 + $0x84] sm:$0xff]  }
  0x83   : > { %858 = vst [vmem:[#allocation2 + $0xa0] sm:$0xf] %v664_v23  ;;  %v7012_v33 = vrot.slane %v675_v35, 7  ;;  %v4967_v40 = vcombine.high %v359_v27, %v359_v27  ;;  %v7020_v47 = vsel %vm1699_vm0, %v1718_v30, %v1719_v46  ;;  %v1722_v48 = vrot.slane %v6326_v11, 1 }
  0x84   : > { %v672_v58 = vor.u32 %v670_v25, %v669_v31  ;;  %v673_v59 = vrot.slane %v669_v31, 4  ;;  %v684_v54 = vshrl.u32 %v4966_v36, 16  ;;  %v687_v63 = vshll.u32 %v4966_v36, 16  ;;  %v6331_v8 = vld [vmem:[#allocation2 + $0x8] ss:$0 sps:$4 sm:$0x11]  }
  0x85   : > { %5778 = vmatpush3.bf16.msra.mxu0 %v6327_v45  ;;  %v7022_v51 = vld [vmem:[#allocation2 + $0x90] sm:$0xff]   ;;  %v680_v60 = vor.u32 %v678_v53, %v7012_v33  ;;  %v692_v0 = vshrl.u32 %v4967_v40, 16  ;;  %v695_v2 = vshll.u32 %v4967_v40, 16  ;;  %v7032_v46 = vsel %vm1699_vm0, %v1721_v29, %v1722_v48  ;;  %v838_v36 = vld [vmem:[#allocation2 + $0x80] sm:$0x1] }
  0x86   : > { %5779 = vmatprep.subr.bf16.mxu0 %v6335_v26  ;;  %5523 = vmatprep.mubr.bf16.mxu1 %v7022_v51  ;;  %v863_v30 = vsel %vm6659_vm11, %v672_v58, %v862_v18  ;;  %v869_v45 = vld [vmem:[#allocation2 + $0xb4] sm:$0xf]  ;;  %v1724_v3 = vrot.slane %v6328_v49, 1  ;;  %v686_v4 = vrot.slane %v684_v54, 7  ;;  %v1725_v7 = vrot.slane %v6329_v50, 1 }
  0x87   : > { %v681_v5 = vsel %vm6652_vm10, %v673_v59, %v680_v60  ;;  %864 = vst [vmem:[#allocation2 + $0xa8] sm:$0xf] %v863_v30  ;;  %v7034_v6 = vrot.slane %v692_v0, 7  ;;  %v1249_v10 = vshrl.u32 %v6977_v52, 16  ;;  %v597_v11 = vrot.slane %v6863_v12, 4 }
  0x88   : > { %5748 = vmatmul.mubr.bf16.gmra.mrb[8].mxu0 %v7020_v47  ;;  %865 = vst [vmem:[#allocation2 + $0xac] sm:$0xf] %v681_v5  ;;  %v689_v21 = vor.u32 %v687_v63, %v686_v4  ;;  %v690_v25 = vrot.slane %v686_v4, 4  ;;  %v7043_v23 = vsel %vm1699_vm0, %v1724_v3, %v1725_v7  ;;  %v1256_v53 = vshll.u32 %v6331_v8, 16  ;;  %v831_v18 = vld [vmem:[#allocation2 + $0x74] sm:$0x1] }
  0x89   : > { %5751 = vmatprep.mubr.bf16.mxu0 %v7032_v46  ;;  %5780 = vmatpush3.bf16.msra.mxu0 %v6335_v26  ;;  %v697_v35 = vor.u32 %v695_v2, %v7034_v6  ;;  %v614_v27 = vrot.slane %v6905_v15, 4  ;;  %v1253_v29 = vrot.slane %v1251_v19, 1  ;;  %v832_v31 = vsel %vm6665_vm14, %v597_v11, %v831_v18  ;;  %v6333_v40 = vld [vmem:[#allocation2 + $0x6c] sm:$0xfe]   ;;  %v845_v58 = vld [vmem:[#allocation2 + $0x8c] sm:$0x1] }
  0x8a   : > { %5781 = vmatprep.subr.bf16.mxu0 %v6341_v41  ;;  %v7039_v9 = vld [vmem:[#allocation2 + $0x9c] sm:$0xff]   ;;  %v870_v12 = vsel %vm6659_vm11, %v689_v21, %v869_v45  ;;  %833 = vst [vmem:[#allocation2 + $0x74] sm:$0x1] %v832_v31  ;;  %v1258_v15 = vrot.slane %v1256_v53, 1  ;;  %v631_v49 = vrot.slane %v6924_v42, 4  ;;  %v648_v52 = vrot.slane %v6965_v17, 4 }
  0x8b   : > { %5524 = vmatmul.mubr.bf16.gmra.mrb[24].mxu1 %v7039_v9  ;;  %v698_v26 = vsel %vm6652_vm10, %v690_v25, %v697_v35  ;;  %871 = vst [vmem:[#allocation2 + $0xb4] sm:$0xf] %v870_v12  ;;  %v839_v48 = vsel %vm6665_vm14, %v614_v27, %v838_v36  ;;  %v1254_v19 = vor.u32 %v1253_v29, %v1249_v10  ;;  %v6339_v60 = vld [vmem:[#allocation2 + $0x84] sm:$0xfe]   ;;  %v6347_v42 = vld [vmem:[%s7491_s1 + $0x1b0] sm:$0xff]   ;;  %v1727_v17 = vrot.slane %v6333_v40, 1 }
  0x8c   : > { %872 = vst [vmem:[#allocation2 + $0xb8] sm:$0xf] %v698_v26  ;;  %840 = vst [vmem:[#allocation2 + $0x80] sm:$0x1] %v839_v48  ;;  %v846_v59 = vsel %vm6665_vm14, %v631_v49, %v845_v58  ;;  %v852_v54 = vld [vmem:[#allocation2 + $0x98] sm:$0x1] }
  0x8d   : > { %5782 = vmatpush3.bf16.msra.mxu0 %v6341_v41  ;;  %v6336_v41 = vld [vmem:[#allocation2 + $0x78] sm:$0xfe]   ;;  %847 = vst [vmem:[#allocation2 + $0x8c] sm:$0x1] %v846_v59  ;;  %v1259_v0 = vsel %vm1247_vm1, %v1254_v19, %v1258_v15  ;;  %v853_v2 = vsel %vm6665_vm14, %v648_v52, %v852_v54  ;;  %v665_v30 = vrot.slane %v6992_v62, 4  ;;  %v1733_v7 = vrot.slane %v6339_v60, 1 }
  0x8e   : > { %5783 = vmatprep.subr.bf16.mxu0 %v6347_v42  ;;  %854 = vst [vmem:[#allocation2 + $0x98] sm:$0x1] %v853_v2  ;;  %v1730_v3 = vrot.slane %v6336_v41, 1  ;;  %v6342_v8 = vld [vmem:[#allocation2 + $0x90] sm:$0xfe]   ;;  %v6353_v11 = vld [vmem:[%s7491_s1 + $0x1b8] sm:$0xff]  }
  0x8f   : > { %v7058_v50 = vld [vmem:[#allocation2 + $0xa8] sm:$0xff]   ;;  %v859_v62 = vld [vmem:[#allocation2 + $0xa4] sm:$0x1]  ;;  %v682_v25 = vrot.slane %v7012_v33, 4  ;;  %v699_v35 = vrot.slane %v7034_v6, 4  ;;  %v246_v12 = vld [vmem:[%s6620_s29 + $0xf0] sm:$0xff] }
  0x90   : > { %5752 = vmatmul.mubr.bf16.gmra.mrb[12].mxu0 %v7043_v23  ;;  %5527 = vmatprep.mubr.bf16.mxu1 %v7058_v50  ;;  %v6338_v18 = vld [vmem:[%s7491_s1 + $0x88] sm:$0xff]   ;;  %v860_v26 = vsel %vm6665_vm14, %v665_v30, %v859_v62  ;;  %v1736_v33 = vrot.slane %v6342_v8, 1  ;;  %v247_v6 = vld [vmem:[%s6620_s29 + $0xf8] sm:$0xff]  ;;  %v866_v15 = vld [vmem:[#allocation2 + $0xb0] sm:$0x1]  ;;  %vm278_vm5 = vcmp.gt.f32.partialorder %v246_v12, 0.0 }
  0x91   : > { %v6334_v5 = vld [vmem:[#allocation2 + $0x74] ss:$0 sps:$4 sm:$0x11]   ;;  %5784 = vmatpush3.bf16.msra.mxu0 %v6347_v42  ;;  %861 = vst [vmem:[#allocation2 + $0xa4] sm:$0x1] %v860_v26  ;;  %v867_v49 = vsel %vm6665_vm14, %v682_v25, %v866_v15  ;;  %vm279_vm6 = vcmp.gt.f32.partialorder %v247_v6, 0.0 }
  0x92   : > { %v1728_v4 = vrot.slane %v6334_v5, 1  ;;  %5785 = vmatprep.subr.bf16.mxu0 %v6353_v11  ;;  %v6345_v36 = vld [vmem:[#allocation2 + $0x9c] sm:$0xfe]   ;;  %v6344_v52 = vld [vmem:[%s7491_s1 + $0x90] sm:$0xff]   ;;  %868 = vst [vmem:[#allocation2 + $0xb0] sm:$0x1] %v867_v49 }
  0x93   : > { %v7068_v63 = vld [vmem:[#allocation2 + $0xb4] sm:$0xff]   ;;  %v6337_v45 = vld [vmem:[#allocation2 + $0x80] ss:$0 sps:$4 sm:$0x11]   ;;  %v873_v19 = vld [vmem:[#allocation2 + $0xbc] sm:$0x1] }
  0x94   : > { %5528 = vmatmul.mubr.bf16.gmra.mrb[28].mxu1 %v7068_v63  ;;  %v1731_v10 = vrot.slane %v6337_v45, 1  ;;  %v7079_v21 = vsel %vm1699_vm0, %v1727_v17, %v1728_v4  ;;  %v6340_v27 = vld [vmem:[#allocation2 + $0x8c] ss:$0 sps:$4 sm:$0x11]   ;;  %v1739_v41 = vrot.slane %v6345_v36, 1  ;;  %v310_v59 = vsel %vm278_vm5, 1.0, %v6511_v16 }
  0x95   : > { %5547 = vmatprep.mubr.bf16.mxu1 %v1259_v0  ;;  %5755 = vmatprep.mubr.bf16.mxu0 %v7079_v21  ;;  %v1734_v29 = vrot.slane %v6340_v27, 1  ;;  %v6343_v31 = vld [vmem:[#allocation2 + $0x98] ss:$0 sps:$4 sm:$0x11]   ;;  %v6348_v58 = vld [vmem:[#allocation2 + $0xa8] sm:$0xfe]  }
  0x96   : > { %v7085_v53 = vsel %vm1699_vm0, %v1730_v3, %v1731_v10  ;;  %5786 = vmatpush3.bf16.msra.mxu0 %v6353_v11  ;;  %v1737_v48 = vrot.slane %v6343_v31, 1  ;;  %v311_v42 = vsel %vm279_vm6, 1.0, %v6511_v16  ;;  %v6351_v54 = vld [vmem:[#allocation2 + $0xb4] sm:$0xfe]   ;;  %v1742_v16 = vrot.slane %v6348_v58, 1  ;;  %v7125_v8 = vld [vmem:[#allocation2 + $0x6c] sm:$0xff]  }
  0x97   : > { %v7097_v40 = vsel %vm1699_vm0, %v1733_v7, %v1734_v29  ;;  %v327_v0 = vpack.c.bf16 %v311_v42, %v310_v59  ;;  %v6350_v2 = vld [vmem:[%s7491_s1 + $0x98] sm:$0xff]   ;;  %v1745_v7 = vrot.slane %v6351_v54, 1  ;;  %v6358_v10 = vld [vmem:[%s7491_s1 + $0xa0] sm:$0xff]   ;;  %v6357_v27 = vld [vmem:[#allocation2 + $0x74] ss:$0 sps:$4 sm:$0x11]  }
  0x98   : > { %5756 = vmatmul.mubr.bf16.gmra.mrb[16].mxu0 %v7085_v53  ;;  %v6346_v60 = vld [vmem:[#allocation2 + $0xa4] ss:$0 sps:$4 sm:$0x11]   ;;  %v880_v36 = vld [vmem:[#allocation2 + $0xc8] sm:$0x1]  ;;  %v1364_v54 = vshll.u32 %v6357_v27, 16 }
  0x99   : > { %5759 = vmatprep.mubr.bf16.mxu0 %v7097_v40  ;;  %v1740_v17 = vrot.slane %v6346_v60, 1  ;;  %v361_v5 = vsel %vm328_vm2, %v327_v0, 0  ;;  %v6349_v45 = vld [vmem:[#allocation2 + $0xb0] ss:$0 sps:$4 sm:$0x11]   ;;  %v7133_v11 = vld [vmem:[%s7491_s1 + $0x1c0] sm:$0xff]  }
  0x9a   : > { %v4968_v3 = vcombine.low %v361_v5, %v361_v5  ;;  %v4969_v4 = vcombine.high %v361_v5, %v361_v5  ;;  %v1743_v62 = vrot.slane %v6349_v45, 1  ;;  %5819 = vmatprep.subr.bf16.mxu0 %v7133_v11  ;;  %v6364_v0 = vld [vmem:[%s7491_s1 + $0xa8] sm:$0xff]   ;;  %v1357_v38 = vshrl.u32 %v7125_v8, 16 }
  0x9b   : > { %v7121_v30 = vsel %vm1699_vm0, %v1739_v41, %v1740_v17  ;;  %v6361_v17 = vld [vmem:[#allocation2 + $0x80] ss:$0 sps:$4 sm:$0x11]   ;;  %v1366_v43 = vrot.slane %v1364_v54, 1  ;;  %v1381_v27 = vshrl.u32 %v6362_v32, 16 }
  0x9c   : > { %5548 = vmatmul.mubr.bf16.vlgmr.msra.gmra.mrb[0].mxu1 %v6733_v14  ;;  %v7108_v14 = vsel %vm1699_vm0, %v1736_v33, %v1737_v48  ;;  %v701_v25 = vshrl.u32 %v4968_v3, 16  ;;  %v712_v12 = vshll.u32 %v4969_v4, 16  ;;  %v876_v33 = vld [vmem:[#allocation2 + $0xc0] sm:$0xf]  ;;  %v7137_v6 = vsel %vm1699_vm0, %v1742_v16, %v1743_v62  ;;  %v6360_v48 = vld [vmem:[#allocation2 + $0x78] sm:$0xff]   ;;  %v6366_v62 = vld [vmem:[#allocation2 + $0x90] sm:$0xff]  }
  0x9d   : > { %5580 = vmatpush3.bf16.msra.mxu1 %v6990_v61  ;;  %5551 = vmatprep.mubr.bf16.mxu1 %v6752_v39  ;;  %v874_v61 = vsel %vm6665_vm14, %v699_v35, %v873_v19  ;;  %v704_v35 = vshll.u32 %v4968_v3, 16  ;;  %v1369_v45 = vshrl.u32 %v6360_v48, 16  ;;  %v6363_v16 = vld [vmem:[#allocation2 + $0x8c] ss:$0 sps:$4 sm:$0x11]  }
  0x9e   : > { %5581 = vmatprep.subr.bf16.mxu1 %v6338_v18  ;;  %875 = vst [vmem:[#allocation2 + $0xbc] sm:$0x1] %v874_v61  ;;  %v703_v29 = vrot.slane %v701_v25, 7  ;;  %v1359_v61 = vshll.u32 %v7125_v8, 16 }
  0x9f   : > { %v6367_v25 = vld [vmem:[#allocation2 + $0x98] ss:$0 sps:$4 sm:$0x11]   ;;  %v6369_v54 = vld [vmem:[#allocation2 + $0xa4] ss:$0 sps:$4 sm:$0x11]  }
  0xa0   : > { %5760 = vmatmul.mubr.bf16.gmra.mrb[20].mxu0 %v7108_v14  ;;  %v706_v49 = vor.u32 %v704_v35, %v703_v29  ;;  %v1361_v5 = vrot.slane %v1359_v61, 1  ;;  %v6370_v35 = vld [vmem:[%s7491_s1 + $0xb0] sm:$0xff]  }
  0xa1   : > { %5582 = vmatpush3.bf16.msra.mxu1 %v6338_v18  ;;  %5763 = vmatprep.mubr.bf16.mxu0 %v7121_v30  ;;  %v709_v18 = vshrl.u32 %v4969_v4, 16  ;;  %v1376_v4 = vshll.u32 %v6361_v17, 16 }
  0xa2   : > { %5583 = vmatprep.subr.bf16.mxu1 %v6344_v52  ;;  %v877_v60 = vsel %vm6659_vm11, %v706_v49, %v876_v33  ;;  %v1388_v33 = vshll.u32 %v6363_v16, 16  ;;  %v1400_v49 = vshll.u32 %v6367_v25, 16  ;;  %v6365_v16 = vld [vmem:[%s7491_s1 + $0x1c8] sm:$0xff]  }
  0xa3   : > { %v711_v31 = vrot.slane %v709_v18, 7  ;;  %878 = vst [vmem:[#allocation2 + $0xc0] sm:$0xf] %v877_v60  ;;  %v1362_v18 = vor.u32 %v1361_v5, %v1357_v38  ;;  %v6372_v60 = vld [vmem:[#allocation2 + $0xa8] sm:$0xff]  }
  0xa4   : > { %5552 = vmatmul.mubr.bf16.gmra.mrb[4].mxu1 %v6760_v56  ;;  %v1390_v17 = vrot.slane %v1388_v33, 1  ;;  %v6373_v38 = vld [vmem:[#allocation2 + $0xb0] ss:$0 sps:$4 sm:$0x11]   ;;  %v1417_v25 = vshrl.u32 %v6372_v60, 16 }
  0xa5   : > { %5555 = vmatprep.mubr.bf16.mxu1 %v6790_v24  ;;  %5584 = vmatpush3.bf16.msra.mxu1 %v6344_v52  ;;  %v6352_v26 = vld [vmem:[#allocation2 + $0xbc] ss:$0 sps:$4 sm:$0x11]   ;;  %v707_v52 = vrot.slane %v703_v29, 4  ;;  %v714_v19 = vor.u32 %v712_v12, %v711_v31  ;;  %v716_v41 = vrot.slane %v711_v31, 4  ;;  %v1378_v12 = vrot.slane %v1376_v4, 1 }
  0xa6   : > { %5585 = vmatprep.subr.bf16.mxu1 %v6350_v2  ;;  %v1746_v15 = vrot.slane %v6352_v26, 1  ;;  %v1395_v29 = vshll.u32 %v6366_v62, 16  ;;  %v6375_v33 = vld [vmem:[#allocation2 + $0xbc] ss:$0 sps:$4 sm:$0x11]  }
  0xa7   : > { %v715_v59 = vsel %vm6652_vm10, %v707_v52, %v714_v19  ;;  %v881_v42 = vsel %vm6665_vm14, %v716_v41, %v880_v36  ;;  %v6368_v52 = vld [vmem:[#allocation2 + $0x9c] sm:$0xff]   ;;  %v7166_v41 = vsel %vm1247_vm1, %v1362_v18, %v1366_v43  ;;  %v1419_v43 = vshll.u32 %v6372_v60, 16 }
  0xa8   : > { %5764 = vmatmul.mubr.bf16.gmra.mrb[24].mxu0 %v7137_v6  ;;  %v7141_v58 = vsel %vm1699_vm0, %v1745_v7, %v1746_v15  ;;  %879 = vst [vmem:[#allocation2 + $0xc4] sm:$0xf] %v715_v59  ;;  %882 = vst [vmem:[#allocation2 + $0xc8] sm:$0x1] %v881_v42  ;;  %v1383_v7 = vshll.u32 %v6362_v32, 16  ;;  %v1397_v59 = vrot.slane %v1395_v29, 1 }
  0xa9   : > { %5586 = vmatpush3.bf16.msra.mxu1 %v6350_v2  ;;  %5767 = vmatprep.mubr.bf16.mxu0 %v7141_v58  ;;  %v1371_v2 = vshll.u32 %v6360_v48, 16  ;;  %v1393_v48 = vshrl.u32 %v6366_v62, 16  ;;  %v7172_v42 = vld [vmem:[#allocation2 + $0x18] sm:$0xff]   ;;  %v1407_v32 = vshll.u32 %v6368_v52, 16  ;;  %v1412_v62 = vshll.u32 %v6369_v54, 16  ;;  %v6371_v29 = vld [vmem:[%s7491_s1 + $0x1d0] sm:$0xff]  }
  0xaa   : > { %5587 = vmatprep.subr.bf16.mxu1 %v6358_v10  ;;  %v1385_v15 = vrot.slane %v1383_v7, 1 }
  0xab   : > { %v1373_v3 = vrot.slane %v1371_v2, 1  ;;  %v1402_v2 = vrot.slane %v1400_v49, 1  ;;  %v1398_v5 = vor.u32 %v1397_v59, %v1393_v48  ;;  %v1409_v7 = vrot.slane %v1407_v32, 1  ;;  %v6379_v59 = vld [vmem:[#allocation2 + $0x8] ss:$0 sps:$4 sm:$0x11]  }
  0xac   : > { %5556 = vmatmul.mubr.bf16.gmra.mrb[8].mxu1 %v6834_v28  ;;  %v6378_v32 = vld [vmem:[#allocation2] sm:$0xfe]  }
  0xad   : > { %5559 = vmatprep.mubr.bf16.mxu1 %v6859_v1  ;;  %5588 = vmatpush3.bf16.msra.mxu1 %v6358_v10  ;;  %v1374_v26 = vor.u32 %v1373_v3, %v1369_v45  ;;  %v6376_v45 = vld [vmem:[%s7491_s1 + $0xb8] sm:$0xff]   ;;  %v1405_v3 = vshrl.u32 %v6368_v52, 16  ;;  %v7190_v18 = vsel %vm1247_vm1, %v1398_v5, %v1402_v2  ;;  %v6381_v5 = vld [vmem:[%s7491_s1 + $0x1e0] sm:$0xff]  }
  0xae   : > { %5589 = vmatprep.subr.bf16.mxu1 %v6364_v0  ;;  %v6377_v52 = vld [vmem:[%s7491_s1 + $0x1d8] sm:$0xff]  }
  0xaf   : > { %v6354_v10 = vld [vmem:[#allocation2 + $0xc0] sm:$0xfe]   ;;  %v6355_v8 = vld [vmem:[#allocation2 + $0xc8] ss:$0 sps:$4 sm:$0x11]   ;;  %v7170_v61 = vsel %vm1247_vm1, %v1374_v26, %v1378_v12  ;;  %v7198_v12 = vld [vmem:[#allocation2 + $0x30] sm:$0xff]  }
  0xb0   : > { %v1748_v31 = vrot.slane %v6354_v10, 1  ;;  %v1749_v36 = vrot.slane %v6355_v8, 1  ;;  %v6374_v10 = vld [vmem:[#allocation2 + $0xb4] sm:$0xff]   ;;  %v7186_v8 = vld [vmem:[#allocation2 + $0x24] sm:$0xff]  }
  0xb1   : > { %5590 = vmatpush3.bf16.msra.mxu1 %v6364_v0  ;;  %v1386_v0 = vor.u32 %v1385_v15, %v1381_v27  ;;  %v1421_v27 = vrot.slane %v1419_v43, 1  ;;  %v7195_v26 = vld [vmem:[%s7491_s1 + $0xc0] sm:$0xff]   ;;  %v1431_v15 = vshll.u32 %v6374_v10, 16  ;;  %v1429_v49 = vshrl.u32 %v6374_v10, 16 }
  0xb2   : > { %5591 = vmatprep.subr.bf16.mxu1 %v6370_v35  ;;  %v7163_v19 = vsel %vm1699_vm0, %v1748_v31, %v1749_v36  ;;  %v1410_v31 = vor.u32 %v1409_v7, %v1405_v3  ;;  %v1414_v36 = vrot.slane %v1412_v62, 1  ;;  %v1701_v3 = vrot.slane %v6379_v59, 1  ;;  %v6383_v7 = vld [vmem:[%s7491_s1 + $0x1e8] sm:$0xff]   ;;  %v7237_v10 = vld [vmem:[#allocation2 + $0x60] sm:$0xff]   ;;  %v6397_v59 = vld [vmem:[%s7491_s1 + $0x218] sm:$0xff]  }
  0xb3   : > { %5768 = vmatmul.mubr.bf16.gmra.mrb[28].mxu0 %v7163_v19  ;;  %v7184_v4 = vsel %vm1247_vm1, %v1386_v0, %v1390_v17  ;;  %v1433_v54 = vrot.slane %v1431_v15, 1  ;;  %v1436_v0 = vshll.u32 %v6375_v33, 16  ;;  %v7213_v17 = vld [vmem:[#allocation2 + $0x3c] sm:$0xff]  }
  0xb4   : > { %5560 = vmatmul.mubr.bf16.gmra.mrb[12].mxu1 %v6882_v34  ;;  %5787 = vmatprep.mubr.bf16.mxu0 %v7172_v42  ;;  %v7211_v60 = vsel %vm1247_vm1, %v1410_v31, %v1414_v36  ;;  %v6388_v33 = vld [vmem:[%s7491_s1 + $0x1f8] sm:$0xff]   ;;  %v6382_v31 = vld [vmem:[%s7491_s1 + $0xc8] sm:$0xff]   ;;  %v6391_v15 = vld [vmem:[%s7491_s1 + $0x200] sm:$0xff]  }
  0xb5   : > { %5563 = vmatprep.mubr.bf16.mxu1 %v6911_v20  ;;  %5592 = vmatpush3.bf16.msra.mxu1 %v6370_v35  ;;  %v1424_v35 = vshll.u32 %v6373_v38, 16  ;;  %v7219_v38 = vld [vmem:[#allocation2 + $0x48] sm:$0xff]   ;;  %v1434_v43 = vor.u32 %v1433_v54, %v1429_v49  ;;  %v7253_v36 = vld [vmem:[#allocation2 + $0x78] sm:$0xff]   ;;  %v6417_v49 = vld [vmem:[%s7491_s1 + $0x100] sm:$0xff]  }
  0xb6   : > { %5593 = vmatprep.subr.bf16.mxu1 %v6376_v45  ;;  %v6403_v54 = vld [vmem:[%s7491_s1 + $0x238] sm:$0xff]  }
  0xb7   : > { %v1426_v48 = vrot.slane %v1424_v35, 1 }
  0xb9   : > { %5594 = vmatpush3.bf16.msra.mxu1 %v6376_v45  ;;  %v1438_v45 = vrot.slane %v1436_v0, 1  ;;  %v6420_v0 = vld [vmem:[%s7491_s1 + $0x110] sm:$0xff]  }
  0xba   : > { %5627 = vmatprep.subr.bf16.mxu1 %v7195_v26 }
  0xbb   : > { %5788 = vmatmul.mubr.bf16.vlgmr.msra.gmra.mrb[0].mxu0 %v7186_v8  ;;  %v7231_v62 = vsel %vm1247_vm1, %v1434_v43, %v1438_v45 }
  0xbc   : > { %5564 = vmatmul.mubr.bf16.gmra.mrb[16].mxu1 %v7166_v41  ;;  %5820 = vmatpush3.bf16.msra.mxu0 %v7133_v11  ;;  %v1422_v11 = vor.u32 %v1421_v27, %v1417_v25  ;;  %v7233_v25 = vld [vmem:[#allocation2 + $0x54] sm:$0xff]  }
  0xbd   : > { %5567 = vmatprep.mubr.bf16.mxu1 %v7170_v61  ;;  %5791 = vmatprep.mubr.bf16.mxu0 %v7198_v12  ;;  %v6385_v27 = vld [vmem:[%s7491_s1 + $0x1f0] sm:$0xff]  }
  0xbe   : > { %5821 = vmatprep.subr.bf16.mxu0 %v6365_v16  ;;  %v7217_v2 = vsel %vm1247_vm1, %v1422_v11, %v1426_v48  ;;  %v6384_v11 = vld [vmem:[%s7491_s1 + $0xd0] sm:$0xff]   ;;  %v7285_v48 = vld [vmem:[#allocation2 + $0xc0] sm:$0xff]  }
  0xc0   : > { %5822 = vmatpush3.bf16.msra.mxu0 %v6365_v16  ;;  %v1700_v16 = vrot.slane %v6378_v32, 1  ;;  %v6421_v32 = vld [vmem:[%s7491_s1 + $0x118] sm:$0xff]  }
  0xc1   : > { %5823 = vmatprep.subr.bf16.mxu0 %v6371_v29 }
  0xc2   : > { %v1702_v35 = vsel %vm1699_vm0, %v1700_v16, %v1701_v3 }
  0xc3   : > { %5792 = vmatmul.mubr.bf16.gmra.mrb[4].mxu0 %v7213_v17 }
  0xc4   : > { %5568 = vmatmul.mubr.bf16.gmra.mrb[20].mxu1 %v7184_v4  ;;  %5795 = vmatprep.mubr.bf16.mxu0 %v7219_v38 }
  0xc5   : > { %5571 = vmatprep.mubr.bf16.mxu1 %v7190_v18  ;;  %5824 = vmatpush3.bf16.msra.mxu0 %v6371_v29  ;;  %v7247_v29 = vld [vmem:[#allocation2 + $0x6c] sm:$0xff]  }
  0xc6   : > { %5825 = vmatprep.subr.bf16.mxu0 %v6377_v52 }
  0xc9   : > { %5826 = vmatpush3.bf16.msra.mxu0 %v6377_v52  ;;  %v6393_v52 = vld [vmem:[%s7491_s1 + $0x208] sm:$0xff]  }
  0xca   : > { %5827 = vmatprep.subr.bf16.mxu0 %v6381_v5 }
  0xcb   : > { %5796 = vmatmul.mubr.bf16.gmra.mrb[8].mxu0 %v7233_v25 }
  0xcc   : > { %5572 = vmatmul.mubr.bf16.gmra.mrb[24].mxu1 %v7211_v60  ;;  %5799 = vmatprep.mubr.bf16.mxu0 %v7237_v10 }
  0xcd   : > { %5575 = vmatprep.mubr.bf16.mxu1 %v7217_v2  ;;  %5828 = vmatpush3.bf16.msra.mxu0 %v6381_v5  ;;  %v6404_v5 = vld [vmem:[#allocation2 + $0xcc] sm:$0xff]  }
  0xce   : > { %5829 = vmatprep.subr.bf16.mxu0 %v6383_v7  ;;  %v1455_v3 = vshll.u32 %v6404_v5, 16 }
  0xd1   : > { %5830 = vmatpush3.bf16.msra.mxu0 %v6383_v7 }
  0xd2   : > { %5831 = vmatprep.subr.bf16.mxu0 %v6385_v27 }
  0xd3   : > { %5800 = vmatmul.mubr.bf16.gmra.mrb[12].mxu0 %v7247_v29 }
  0xd4   : > { %5576 = vmatmul.mubr.bf16.gmra.mrb[28].mxu1 %v7231_v62  ;;  %5803 = vmatprep.mubr.bf16.mxu0 %v7253_v36 }
  0xd5   : > { %5595 = vmatprep.mubr.bf16.mxu1 %v1702_v35  ;;  %5832 = vmatpush3.bf16.msra.mxu0 %v6385_v27  ;;  %v6423_v27 = vld [vmem:[%s7491_s1 + $0x128] sm:$0xff]  }
  0xd6   : > { %5833 = vmatprep.subr.bf16.mxu0 %v6388_v33 }
  0xd9   : > { %5834 = vmatpush3.bf16.msra.mxu0 %v6388_v33  ;;  %v1453_v33 = vshrl.u32 %v6404_v5, 16 }
  0xda   : > { %5867 = vmatprep.subr.bf16.mxu0 %v6391_v15 }
  0xdb   : > { %5804 = vmatmul.mubr.bf16.gmra.mrb[16].mxu0 %v6979_v57  ;;  %v6392_v57 = vld [vmem:[%s7491_s1 + $0xe8] sm:$0xff]  }
  0xdc   : > { %5596 = vmatmul.mubr.bf16.vlgmr.msra.gmra.mrb[0].mxu1 %v6886_v44  ;;  %v6386_v44 = vld [vmem:[%s7491_s1 + $0xd8] sm:$0xff]   ;;  %5807 = vmatprep.mubr.bf16.mxu0 %v7022_v51  ;;  %v6394_v51 = vld [vmem:[%s7491_s1 + $0xf0] sm:$0xff]  }
  0xdd   : > { %5628 = vmatpush3.bf16.msra.mxu1 %v7195_v26  ;;  %5599 = vmatprep.mubr.bf16.mxu1 %v6894_v55  ;;  %v6390_v26 = vld [vmem:[%s7491_s1 + $0xe0] sm:$0xff]  }
  0xde   : > { %5629 = vmatprep.subr.bf16.mxu1 %v6382_v31 }
  0xe1   : > { %5630 = vmatpush3.bf16.msra.mxu1 %v6382_v31  ;;  %v1457_v31 = vrot.slane %v1455_v3, 1 }
  0xe2   : > { %5631 = vmatprep.subr.bf16.mxu1 %v6384_v11 }
  0xe3   : > { %5808 = vmatmul.mubr.bf16.gmra.mrb[20].mxu0 %v7039_v9  ;;  %v6396_v9 = vld [vmem:[%s7491_s1 + $0xf8] sm:$0xff]  }
  0xe4   : > { %5600 = vmatmul.mubr.bf16.gmra.mrb[4].mxu1 %v6920_v37  ;;  %5811 = vmatprep.mubr.bf16.mxu0 %v7058_v50  ;;  %v6389_v50 = vld [vmem:[#allocation2 + $0xcc] sm:$0xff]  }
  0xe5   : > { %5603 = vmatprep.mubr.bf16.mxu1 %v6952_v13  ;;  %5632 = vmatpush3.bf16.msra.mxu1 %v6384_v11 }
  0xe6   : > { %5633 = vmatprep.subr.bf16.mxu1 %v6386_v44 }
  0xe9   : > { %5634 = vmatpush3.bf16.msra.mxu1 %v6386_v44 }
  0xea   : > { %5635 = vmatprep.subr.bf16.mxu1 %v6390_v26 }
  0xeb   : > { %5812 = vmatmul.mubr.bf16.gmra.mrb[24].mxu0 %v7068_v63 }
  0xec   : > { %5604 = vmatmul.mubr.bf16.gmra.mrb[8].mxu1 %v6956_v22  ;;  %5815 = vmatprep.mubr.bf16.mxu0 %v7285_v48 }
  0xed   : > { %5607 = vmatprep.mubr.bf16.mxu1 %v7020_v47  ;;  %5636 = vmatpush3.bf16.msra.mxu1 %v6390_v26  ;;  %v6425_v26 = vld [vmem:[%s7491_s1 + $0x138] sm:$0xff]  }
  0xee   : > { %5637 = vmatprep.subr.bf16.mxu1 %v6392_v57 }
  0xf1   : > { %5638 = vmatpush3.bf16.msra.mxu1 %v6392_v57 }
  0xf2   : > { %5639 = vmatprep.subr.bf16.mxu1 %v6394_v51 }
  0xf3   : > { %5816 = vmatmul.mubr.bf16.gmra.mrb[28].mxu0 %v6389_v50 }
  0xf4   : > { %5608 = vmatmul.mubr.bf16.gmra.mrb[12].mxu1 %v7032_v46  ;;  %5835 = vmatprep.mubr.bf16.mxu0 %v6752_v39  ;;  %v6395_v39 = vld [vmem:[%s7491_s1 + $0x210] sm:$0xff]  }
  0xf5   : > { %5611 = vmatprep.mubr.bf16.mxu1 %v7043_v23  ;;  %5640 = vmatpush3.bf16.msra.mxu1 %v6394_v51  ;;  %v6426_v51 = vld [vmem:[#allocation2 + $0x84] sm:$0xff]  }
  0xf6   : > { %5641 = vmatprep.subr.bf16.mxu1 %v6396_v9 }
  0xf9   : > { %5642 = vmatpush3.bf16.msra.mxu1 %v6396_v9  ;;  %v6429_v9 = vld [vmem:[#allocation2 + $0xa8] sm:$0xff]  }
  0xfa   : > { %5915 = vmatprep.subr.bf16.mxu1 %v6417_v49 }
  0xfb   : > { %5836 = vmatmul.mubr.bf16.vlgmr.msra.gmra.mrb[0].mxu0 %v6760_v56  ;;  %v6398_v56 = vld [vmem:[%s7491_s1 + $0x220] sm:$0xff]  }
  0xfc   : > { %5612 = vmatmul.mubr.bf16.gmra.mrb[16].mxu1 %v7079_v21  ;;  %5868 = vmatpush3.bf16.msra.mxu0 %v6391_v15 }
  0xfd   : > { %5615 = vmatprep.mubr.bf16.mxu1 %v7085_v53  ;;  %5839 = vmatprep.mubr.bf16.mxu0 %v6790_v24  ;;  %v6399_v24 = vld [vmem:[%s7491_s1 + $0x228] sm:$0xff]  }
  0xfe   : > { %5869 = vmatprep.subr.bf16.mxu0 %v6393_v52 }
 0x100   : > { %5870 = vmatpush3.bf16.msra.mxu0 %v6393_v52 }
 0x101   : > { %5871 = vmatprep.subr.bf16.mxu0 %v6395_v39 }
 0x103   : > { %5840 = vmatmul.mubr.bf16.gmra.mrb[4].mxu0 %v6834_v28  ;;  %v6400_v28 = vld [vmem:[%s7491_s1 + $0x230] sm:$0xff]  }
 0x104   : > { %5616 = vmatmul.mubr.bf16.gmra.mrb[20].mxu1 %v7097_v40  ;;  %5843 = vmatprep.mubr.bf16.mxu0 %v6859_v1  ;;  %v6418_v1 = vld [vmem:[#allocation2 + $0xc] sm:$0xff]  }
 0x105   : > { %5619 = vmatprep.mubr.bf16.mxu1 %v7108_v14  ;;  %5872 = vmatpush3.bf16.msra.mxu0 %v6395_v39 }
 0x106   : > { %5873 = vmatprep.subr.bf16.mxu0 %v6397_v59 }
 0x109   : > { %5874 = vmatpush3.bf16.msra.mxu0 %v6397_v59 }
 0x10a   : > { %5875 = vmatprep.subr.bf16.mxu0 %v6398_v56 }
 0x10b   : > { %5844 = vmatmul.mubr.bf16.gmra.mrb[8].mxu0 %v6882_v34  ;;  %v6419_v34 = vld [vmem:[%s7491_s1 + $0x108] sm:$0xff]  }
 0x10c   : > { %5620 = vmatmul.mubr.bf16.gmra.mrb[24].mxu1 %v7121_v30  ;;  %5847 = vmatprep.mubr.bf16.mxu0 %v6911_v20  ;;  %v6401_v20 = vld [vmem:[#allocation2 + $0xc0] sm:$0xff]  }
 0x10d   : > { %5623 = vmatprep.mubr.bf16.mxu1 %v7137_v6  ;;  %5876 = vmatpush3.bf16.msra.mxu0 %v6398_v56  ;;  %v1441_v43 = vshrl.u32 %v6401_v20, 16 }
 0x10e   : > { %5877 = vmatprep.subr.bf16.mxu0 %v6399_v24 }
 0x111   : > { %5878 = vmatpush3.bf16.msra.mxu0 %v6399_v24 }
 0x112   : > { %5879 = vmatprep.subr.bf16.mxu0 %v6400_v28 }
 0x113   : > { %5848 = vmatmul.mubr.bf16.gmra.mrb[12].mxu0 %v7166_v41 }
 0x114   : > { %5624 = vmatmul.mubr.bf16.gmra.mrb[28].mxu1 %v7141_v58  ;;  %5851 = vmatprep.mubr.bf16.mxu0 %v7170_v61 }
 0x115   : > { %5643 = vmatprep.mubr.bf16.mxu1 %v6418_v1  ;;  %5880 = vmatpush3.bf16.msra.mxu0 %v6400_v28 }
 0x116   : > { %5881 = vmatprep.subr.bf16.mxu0 %v6403_v54 }
 0x119   : > { %5882 = vmatpush3.bf16.msra.mxu0 %v6403_v54 }
 0x11b   : > { %5852 = vmatmul.mubr.bf16.gmra.mrb[16].mxu0 %v7184_v4 }
 0x11c   : > { %5644 = vmatmul.mubr.bf16.vlgmr.msra.gmra.mrb[0].mxu1 %v7172_v42  ;;  %5855 = vmatprep.mubr.bf16.mxu0 %v7190_v18  ;;  %v6402_v42 = vld [vmem:[#allocation2 + $0xc8] ss:$0 sps:$4 sm:$0x11]  }
 0x11d   : > { %5923 = vmatpush3.bf16.msra.mxu1 %v6417_v49  ;;  %5647 = vmatprep.mubr.bf16.mxu1 %v7186_v8  ;;  %v1443_v8 = vshll.u32 %v6401_v20, 16  ;;  %v1448_v16 = vshll.u32 %v6402_v42, 16 }
 0x11e   : > { %5916 = vmatprep.subr.bf16.mxu1 %v6419_v34 }
 0x11f   : > { %v1445_v45 = vrot.slane %v1443_v8, 1  ;;  %v1450_v35 = vrot.slane %v1448_v16, 1 }
 0x121   : > { %5924 = vmatpush3.bf16.msra.mxu1 %v6419_v34  ;;  %v1446_v7 = vor.u32 %v1445_v45, %v1441_v43 }
 0x122   : > { %5917 = vmatprep.subr.bf16.mxu1 %v6420_v0 }
 0x123   : > { %5856 = vmatmul.mubr.bf16.gmra.mrb[20].mxu0 %v7211_v60  ;;  %v1451_v11 = vsel %vm1247_vm1, %v1446_v7, %v1450_v35 }
 0x124   : > { %5648 = vmatmul.mubr.bf16.gmra.mrb[4].mxu1 %v7198_v12  ;;  %v6422_v12 = vld [vmem:[%s7491_s1 + $0x120] sm:$0xff]   ;;  %5859 = vmatprep.mubr.bf16.mxu0 %v7217_v2 }
 0x125   : > { %5651 = vmatprep.mubr.bf16.mxu1 %v7213_v17  ;;  %5925 = vmatpush3.bf16.msra.mxu1 %v6420_v0  ;;  %v6405_v17 = vld [vmem:[#allocation2 + $0xd4] ss:$0 sps:$4 sm:$0x11]  }
 0x126   : > { %5918 = vmatprep.subr.bf16.mxu1 %v6421_v32  ;;  %v1460_v15 = vshll.u32 %v6405_v17, 16 }
 0x128   : > { %v1462_v44 = vrot.slane %v1460_v15, 1 }
 0x129   : > { %5926 = vmatpush3.bf16.msra.mxu1 %v6421_v32 }
 0x12a   : > { %5919 = vmatprep.subr.bf16.mxu1 %v6422_v12 }
 0x12b   : > { %5860 = vmatmul.mubr.bf16.gmra.mrb[24].mxu0 %v7231_v62 }
 0x12c   : > { %5652 = vmatmul.mubr.bf16.gmra.mrb[8].mxu1 %v7219_v38  ;;  %v6424_v38 = vld [vmem:[%s7491_s1 + $0x130] sm:$0xff]   ;;  %5863 = vmatprep.mubr.bf16.mxu0 %v1451_v11 }
 0x12d   : > { %5655 = vmatprep.mubr.bf16.mxu1 %v7233_v25  ;;  %5927 = vmatpush3.bf16.msra.mxu1 %v6422_v12  ;;  %v1458_v25 = vor.u32 %v1457_v31, %v1453_v33 }
 0x12e   : > { %5920 = vmatprep.subr.bf16.mxu1 %v6423_v27 }
 0x12f   : > { %v1463_v57 = vsel %vm1247_vm1, %v1458_v25, %v1462_v44 }
 0x131   : > { %5928 = vmatpush3.bf16.msra.mxu1 %v6423_v27 }
 0x132   : > { %5921 = vmatprep.subr.bf16.mxu1 %v6424_v38 }
 0x133   : > { %5864 = vmatmul.mubr.bf16.gmra.mrb[28].mxu0 %v1463_v57 }
 0x134   : > { %5656 = vmatmul.mubr.bf16.gmra.mrb[12].mxu1 %v7237_v10  ;;  %5883 = vmatprep.mubr.bf16.mxu0 %v6894_v55  ;;  %v6427_v10 = vld [vmem:[#allocation2 + $0x90] sm:$0xff]  }
 0x135   : > { %5659 = vmatprep.mubr.bf16.mxu1 %v7247_v29  ;;  %5929 = vmatpush3.bf16.msra.mxu1 %v6424_v38  ;;  %v6428_v29 = vld [vmem:[#allocation2 + $0x9c] sm:$0xff]   ;;  %v6406_v55 = vld [vmem:[#allocation2 + $0xcc] sm:$0xfe]  }
 0x136   : > { %5922 = vmatprep.subr.bf16.mxu1 %v6425_v26 }
 0x139   : > { %5930 = vmatpush3.bf16.msra.mxu1 %v6425_v26 }
 0x13b   : > { %5884 = vmatmul.mubr.bf16.vlgmr.msra.gmra.mrb[0].mxu0 %v6920_v37  ;;  %v6407_v37 = vld [vmem:[#allocation2 + $0xd4] ss:$0 sps:$4 sm:$0x11]  }
 0x13c   : > { %5660 = vmatmul.mubr.bf16.gmra.mrb[16].mxu1 %v7253_v36  ;;  %5887 = vmatprep.mubr.bf16.mxu0 %v6952_v13  ;;  %v1751_v13 = vrot.slane %v6406_v55, 1 }
 0x13d   : > { %5663 = vmatprep.mubr.bf16.mxu1 %v6426_v51 }
 0x143   : > { %5888 = vmatmul.mubr.bf16.gmra.mrb[4].mxu0 %v6956_v22  ;;  %v1752_v22 = vrot.slane %v6407_v37, 1 }
 0x144   : > { %5664 = vmatmul.mubr.bf16.gmra.mrb[20].mxu1 %v6427_v10  ;;  %5891 = vmatprep.mubr.bf16.mxu0 %v7020_v47 }
 0x145   : > { %5667 = vmatprep.mubr.bf16.mxu1 %v6428_v29  ;;  %v1753_v47 = vsel %vm1699_vm0, %v1751_v13, %v1752_v22 }
 0x14b   : > { %5892 = vmatmul.mubr.bf16.gmra.mrb[8].mxu0 %v7032_v46 }
 0x14c   : > { %5668 = vmatmul.mubr.bf16.gmra.mrb[24].mxu1 %v6429_v9  ;;  %5895 = vmatprep.mubr.bf16.mxu0 %v7043_v23 }
 0x14d   : > { %5671 = vmatprep.mubr.bf16.mxu1 %v7068_v63 }
 0x153   : > { %5896 = vmatmul.mubr.bf16.gmra.mrb[12].mxu0 %v7079_v21 }
 0x154   : > { %5672 = vmatmul.mubr.bf16.gmra.mrb[28].mxu1 %v7285_v48  ;;  %5899 = vmatprep.mubr.bf16.mxu0 %v7085_v53 }
 0x155   : > { %5707 = vmatprep.mubr.bf16.mxu1 %v7166_v41 }
 0x15b   : > { %5900 = vmatmul.mubr.bf16.gmra.mrb[16].mxu0 %v7097_v40 }
 0x15c   : > { %5708 = vmatmul.mubr.bf16.vlgmr.msra.gmra.mrb[16].mxu1 %v7170_v61  ;;  %5903 = vmatprep.mubr.bf16.mxu0 %v7108_v14 }
 0x15d   : > { %5711 = vmatprep.mubr.bf16.mxu1 %v7184_v4 }
 0x163   : > { %5904 = vmatmul.mubr.bf16.gmra.mrb[20].mxu0 %v7121_v30 }
 0x164   : > { %5712 = vmatmul.mubr.bf16.gmra.mrb[20].mxu1 %v7190_v18  ;;  %5907 = vmatprep.mubr.bf16.mxu0 %v7137_v6 }
 0x165   : > { %5715 = vmatprep.mubr.bf16.mxu1 %v7211_v60 }
 0x16b   : > { %5908 = vmatmul.mubr.bf16.gmra.mrb[24].mxu0 %v7141_v58 }
 0x16c   : > { %5716 = vmatmul.mubr.bf16.gmra.mrb[24].mxu1 %v7217_v2  ;;  %5911 = vmatprep.mubr.bf16.mxu0 %v7163_v19 }
 0x16d   : > { %5719 = vmatprep.mubr.bf16.mxu1 %v7231_v62 }
 0x173   : > { %5912 = vmatmul.mubr.bf16.gmra.mrb[28].mxu0 %v1753_v47 }
 0x174   : > { %5720 = vmatmul.mubr.bf16.gmra.mrb[28].mxu1 %v1451_v11 }
 0x1ef   : > { %v5645_v46 = vpop.f32.mrb[0].mxu1 }
 0x1f0   : > { %v2856_v23 = vpop.f32.mrb[1].mxu1 }
 0x1f1   : > { %v5646_v63 = vpop.f32.mrb[2].mxu1 }
 0x1f2   : > { %v2859_v21 = vpop.f32.mrb[3].mxu1 }
 0x1f7   : > { %v5649_v53 = vpop.f32.mrb[4].mxu1 }
 0x1f8   : > { %v2872_v40 = vpop.f32.mrb[5].mxu1 }
 0x1f9   : > { %v5650_v14 = vpop.f32.mrb[6].mxu1 }
 0x1fa   : > { %v2875_v30 = vpop.f32.mrb[7].mxu1 }
 0x1ff   : > { %v5653_v6 = vpop.f32.mrb[8].mxu1 }
 0x200   : > { %v2888_v58 = vpop.f32.mrb[9].mxu1 }
 0x201   : > { %v5654_v41 = vpop.f32.mrb[10].mxu1 }
 0x202   : > { %v2891_v19 = vpop.f32.mrb[11].mxu1 }
 0x207   : > { %v5657_v61 = vpop.f32.mrb[12].mxu1 }
 0x208   : > { %v2904_v4 = vpop.f32.mrb[13].mxu1 }
 0x209   : > { %v5658_v18 = vpop.f32.mrb[14].mxu1 }
 0x20a   : > { %v2907_v60 = vpop.f32.mrb[15].mxu1 }
 0x20e   : > { %v5885_v2 = vpop.f32.mrb[0].mxu0 }
 0x20f   : > { %v5931_v62 = vadd.f32 %v5885_v2, %v5645_v46  ;;  %v4551_v36 = vpop.f32.mrb[1].mxu0 }
 0x210   : > { %v5932_v48 = vadd.f32 %v4551_v36, %v2856_v23  ;;  %v5886_v50 = vpop.f32.mrb[2].mxu0 }
 0x211   : > { %4808 = vst [vmem:[%s7399_s3 + $0x10] sm:$0xff] %v5931_v62  ;;  %v5933_v49 = vadd.f32 %v5886_v50, %v5646_v63  ;;  %v4554_v52 = vpop.f32.mrb[3].mxu0 }
 0x212   : > { %4806 = vst [vmem:[%s7399_s3] sm:$0xff] %v5932_v48  ;;  %v5934_v39 = vadd.f32 %v4554_v52, %v2859_v21 }
 0x213   : > { %4809 = vst [vmem:[%s7399_s3 + $0x18] sm:$0xff] %v5933_v49 }
 0x214   : > { %4807 = vst [vmem:[%s7399_s3 + $0x8] sm:$0xff] %v5934_v39 }
 0x216   : > { %v5889_v59 = vpop.f32.mrb[4].mxu0 }
 0x217   : > { %v5935_v56 = vadd.f32 %v5889_v59, %v5649_v53  ;;  %v4567_v24 = vpop.f32.mrb[5].mxu0 }
 0x218   : > { %v5936_v28 = vadd.f32 %v4567_v24, %v2872_v40  ;;  %v5890_v1 = vpop.f32.mrb[6].mxu0 }
 0x219   : > { %4812 = vst [vmem:[%s7399_s3 + $0x30] sm:$0xff] %v5935_v56  ;;  %v5937_v54 = vadd.f32 %v5890_v1, %v5650_v14  ;;  %v4570_v34 = vpop.f32.mrb[7].mxu0 }
 0x21a   : > { %4810 = vst [vmem:[%s7399_s3 + $0x20] sm:$0xff] %v5936_v28  ;;  %v5938_v20 = vadd.f32 %v4570_v34, %v2875_v30 }
 0x21b   : > { %4813 = vst [vmem:[%s7399_s3 + $0x38] sm:$0xff] %v5937_v54 }
 0x21c   : > { %4811 = vst [vmem:[%s7399_s3 + $0x28] sm:$0xff] %v5938_v20 }
 0x21e   : > { %v5893_v0 = vpop.f32.mrb[8].mxu0 }
 0x21f   : > { %v5939_v42 = vadd.f32 %v5893_v0, %v5653_v6  ;;  %v4583_v8 = vpop.f32.mrb[9].mxu0 }
 0x220   : > { %v5940_v32 = vadd.f32 %v4583_v8, %v2888_v58  ;;  %v5894_v5 = vpop.f32.mrb[10].mxu0 }
 0x221   : > { %4816 = vst [vmem:[%s7399_s3 + $0x50] sm:$0xff] %v5939_v42  ;;  %v5941_v43 = vadd.f32 %v5894_v5, %v5654_v41  ;;  %v4586_v45 = vpop.f32.mrb[11].mxu0 }
 0x222   : > { %4814 = vst [vmem:[%s7399_s3 + $0x40] sm:$0xff] %v5940_v32  ;;  %v5942_v16 = vadd.f32 %v4586_v45, %v2891_v19 }
 0x223   : > { %4817 = vst [vmem:[%s7399_s3 + $0x58] sm:$0xff] %v5941_v43 }
 0x224   : > { %4815 = vst [vmem:[%s7399_s3 + $0x48] sm:$0xff] %v5942_v16 }
 0x226   : > { %v5897_v12 = vpop.f32.mrb[12].mxu0 }
 0x227   : > { %v5943_v17 = vadd.f32 %v5897_v12, %v5657_v61  ;;  %v4599_v3 = vpop.f32.mrb[13].mxu0 }
 0x228   : > { %v5944_v7 = vadd.f32 %v4599_v3, %v2904_v4  ;;  %v5898_v35 = vpop.f32.mrb[14].mxu0 }
 0x229   : > { %4820 = vst [vmem:[%s7399_s3 + $0x70] sm:$0xff] %v5943_v17  ;;  %v5945_v33 = vadd.f32 %v5898_v35, %v5658_v18  ;;  %v4602_v31 = vpop.f32.mrb[15].mxu0 }
 0x22a   : > { %4818 = vst [vmem:[%s7399_s3 + $0x60] sm:$0xff] %v5944_v7  ;;  %v5946_v11 = vadd.f32 %v4602_v31, %v2907_v60 }
 0x22b   : > { %4821 = vst [vmem:[%s7399_s3 + $0x78] sm:$0xff] %v5945_v33 }
 0x22c   : > { %4819 = vst [vmem:[%s7399_s3 + $0x68] sm:$0xff] %v5946_v11 }
 0x22e   : > { %v5901_v44 = vpop.f32.mrb[16].mxu0 }
 0x22f   : > { %v5709_v27 = vpop.f32.mrb[16].mxu1  ;;  %v4615_v57 = vpop.f32.mrb[17].mxu0 }
 0x230   : > { %v3259_v15 = vpop.f32.mrb[17].mxu1  ;;  %v5947_v26 = vadd.f32 %v5901_v44, %v5709_v27  ;;  %v5902_v10 = vpop.f32.mrb[18].mxu0 }
 0x231   : > { %v5710_v38 = vpop.f32.mrb[18].mxu1  ;;  %v5948_v51 = vadd.f32 %v4615_v57, %v3259_v15  ;;  %v4618_v55 = vpop.f32.mrb[19].mxu0 }
 0x232   : > { %v3262_v25 = vpop.f32.mrb[19].mxu1  ;;  %4824 = vst [vmem:[%s7399_s3 + $0x90] sm:$0xff] %v5947_v26  ;;  %v5949_v9 = vadd.f32 %v5902_v10, %v5710_v38 }
 0x233   : > { %4822 = vst [vmem:[%s7399_s3 + $0x80] sm:$0xff] %v5948_v51  ;;  %v5950_v13 = vadd.f32 %v4618_v55, %v3262_v25 }
 0x234   : > { %4825 = vst [vmem:[%s7399_s3 + $0x98] sm:$0xff] %v5949_v9 }
 0x235   : > { %4823 = vst [vmem:[%s7399_s3 + $0x88] sm:$0xff] %v5950_v13 }
 0x236   : > { %v5905_v46 = vpop.f32.mrb[20].mxu0 }
 0x237   : > { %v5713_v29 = vpop.f32.mrb[20].mxu1  ;;  %v4631_v63 = vpop.f32.mrb[21].mxu0 }
 0x238   : > { %v3275_v37 = vpop.f32.mrb[21].mxu1  ;;  %v5951_v23 = vadd.f32 %v5905_v46, %v5713_v29  ;;  %v5906_v53 = vpop.f32.mrb[22].mxu0 }
 0x239   : > { %v5714_v22 = vpop.f32.mrb[22].mxu1  ;;  %v5952_v21 = vadd.f32 %v4631_v63, %v3275_v37  ;;  %v4634_v30 = vpop.f32.mrb[23].mxu0 }
 0x23a   : > { %v3278_v47 = vpop.f32.mrb[23].mxu1  ;;  %4828 = vst [vmem:[%s7399_s3 + $0xb0] sm:$0xff] %v5951_v23  ;;  %v5953_v14 = vadd.f32 %v5906_v53, %v5714_v22 }
 0x23b   : > { %4826 = vst [vmem:[%s7399_s3 + $0xa0] sm:$0xff] %v5952_v21  ;;  %v5954_v58 = vadd.f32 %v4634_v30, %v3278_v47 }
 0x23c   : > { %4829 = vst [vmem:[%s7399_s3 + $0xb8] sm:$0xff] %v5953_v14 }
 0x23d   : > { %4827 = vst [vmem:[%s7399_s3 + $0xa8] sm:$0xff] %v5954_v58 }
 0x23e   : > { %v5909_v61 = vpop.f32.mrb[24].mxu0 }
 0x23f   : > { %v5717_v40 = vpop.f32.mrb[24].mxu1  ;;  %v4647_v18 = vpop.f32.mrb[25].mxu0 }
 0x240   : > { %v3291_v6 = vpop.f32.mrb[25].mxu1  ;;  %v5955_v4 = vadd.f32 %v5909_v61, %v5717_v40  ;;  %v5910_v2 = vpop.f32.mrb[26].mxu0 }
 0x241   : > { %v5718_v41 = vpop.f32.mrb[26].mxu1  ;;  %v5956_v60 = vadd.f32 %v4647_v18, %v3291_v6  ;;  %v4650_v48 = vpop.f32.mrb[27].mxu0 }
 0x242   : > { %v3294_v19 = vpop.f32.mrb[27].mxu1  ;;  %4832 = vst [vmem:[%s7399_s3 + $0xd0] sm:$0xff] %v5955_v4  ;;  %v5957_v36 = vadd.f32 %v5910_v2, %v5718_v41 }
 0x243   : > { %4830 = vst [vmem:[%s7399_s3 + $0xc0] sm:$0xff] %v5956_v60  ;;  %v5958_v49 = vadd.f32 %v4650_v48, %v3294_v19 }
 0x244   : > { %4833 = vst [vmem:[%s7399_s3 + $0xd8] sm:$0xff] %v5957_v36 }
 0x245   : > { %4831 = vst [vmem:[%s7399_s3 + $0xc8] sm:$0xff] %v5958_v49 }
 0x246   : > { %v5913_v59 = vpop.f32.mrb[28].mxu0 }
 0x247   : > { %v5721_v62 = vpop.f32.mrb[28].mxu1  ;;  %v4663_v24 = vpop.f32.mrb[29].mxu0 }
 0x248   : > { %v3307_v50 = vpop.f32.mrb[29].mxu1  ;;  %v5959_v56 = vadd.f32 %v5913_v59, %v5721_v62  ;;  %v5914_v1 = vpop.f32.mrb[30].mxu0 }
 0x249   : > { %v5722_v52 = vpop.f32.mrb[30].mxu1  ;;  %v5960_v28 = vadd.f32 %v4663_v24, %v3307_v50  ;;  %v4666_v34 = vpop.f32.mrb[31].mxu0 }
 0x24a   : > { %v3310_v39 = vpop.f32.mrb[31].mxu1  ;;  %4836 = vst [vmem:[%s7399_s3 + $0xf0] sm:$0xff] %v5959_v56  ;;  %v5961_v54 = vadd.f32 %v5914_v1, %v5722_v52 }
 0x24b   : > { %4834 = vst [vmem:[%s7399_s3 + $0xe0] sm:$0xff] %v5960_v28  ;;  %v5962_v20 = vadd.f32 %v4666_v34, %v3310_v39 }
 0x24c   : > { %4837 = vst [vmem:[%s7399_s3 + $0xf8] sm:$0xff] %v5961_v54 }
 0x24d   : > { %4835 = vst [vmem:[%s7399_s3 + $0xe8] sm:$0xff] %v5962_v20 }
 0x24e   : > { %6443 = shalt.err (!%p6440_p5)
}
 0x24f   : > { %s6444_s23 = scalar_lea.hbm %s7435_s8, 4096  ;;  %s6448_s25 = scalar_lea.hbm %s7492_s2, 8192 }
 0x250   : > { %p6445_p6 = scmp.ne.s32.totalorder %s7435_s8, %s6444_s23  ;;  %p6449_p10 = scmp.lt.u32.totalorder %s7435_s8, %s7492_s2 }
 0x251   : > { %p6450_p11 = scmp.lt.u32.totalorder %s6448_s25, %s6444_s23  ;;  %p6452_p13 = scmp.lt.u32.totalorder %s6444_s23, %s7435_s8 }
 0x252   : > { %p6446_p7 = pnand %p6445_p6, %p6570_p4 }
 0x253   : > { %p6451_p12 = por %p6450_p11, %p6449_p10 }
 0x254   : > { %p6447_p9 = pneg %p6446_p7 }
 0x255   : > { %p6453_p0 = por %p6452_p13, %p6451_p12 }
 0x257   : > { %p6454_p1 = pnand %p6453_p0, %p6447_p9 }
 0x259   : > { %6457 = shalt.err (!%p6454_p1)
}
 0x25a   : > { %s6513_s28 = smov 128   ;;  %s6514_s30 = smov 8  }
 0x25b   : > { %6187 = dma.vmem_to_hbm [thread:$0]  (%p6570_p4), %s7437_s5, 4096, %s7435_s8, %s7444_s12, %s6513_s28, %s6513_s28, %s6514_s30  }
 0x25c PF: > { %p6193_p2 = scmp.ge.s32.totalorder %s6508_s14, 2  ;;  %s4870_s3 = sand.u32 1, %s6488_s9  }
 0x25d   : > { %s4871_s4 = scalar_lea.sflag [#allocation6], %s4870_s3 }
 0x25e   : > { %p6190_p3 = pnand %p6193_p2, %p6577_p8 }
 0x260   : > { %6483 = dma.done.wait (!%p6190_p3), %s4871_s4, 4096  }
 0x261   : > { %6485 = vsyncadd (!%p6190_p3), %s4871_s4, 4294963200  ;;  %s15_s14 = sadd.s32 1, %s6508_s14   ;;  %s7501_s9 = smov %s6492_s10 }
 0x262   : > { %p12_p5 = scmp.ge.s32.totalorder %s15_s14, 4   ;;  %s7502_s10 = smov %s6496_s11 }
 0x263   : > { %s7503_s11 = smov %s6583_s22  ;;  %s7504_s12 = smov %s6504_s13 }
 0x264   : > { %s7505_s13 = smov %s7507_s17  ;;  %14 = sbr.rel (!%p12_p5) target bundleno = 4 (0x4), region = 85 }
 0x26b   :  { %4876 = vsyncpa [#allocation6], 1 }
 0x26c   :  { %4878 = vsyncpa [#allocation6 + $0x1], 1 }

</bundles_post_ra>
